<compile_context>
chip_gen: v6e
topology: v6e:2x2x1
jax: 0.10.0
libtpu: 0.0.40
codegen_flags: <defaults>
</compile_context>

<pallas_src>
import functools

import jax
import jax.numpy as jnp
from jax import lax
from jax.experimental import pallas as pl
from jax.experimental.pallas import tpu as pltpu

LANE = 128  # TPU lane width: keep feature dims multiples of 128


def _round_up(x, m):
    return (x + m - 1) // m * m


def _full_spec(shape):
    zeros = (0,) * len(shape)
    return pl.BlockSpec(shape, lambda i: zeros)


def _vmem_capacity_bytes():
    """Generation-aware VMEM capacity (64 MiB on v7x, 128 MiB on v5e/v6e)."""
    try:
        return int(pltpu.get_tpu_info().vmem_capacity_bytes)
    except Exception:
        return 64 * 1024 * 1024  # conservative (v7x) fallback


def _quantize_rows_int8(a):
    """Per-row symmetric int8 quantization: a ~= q * scale (scale is [N, 1] f32)."""
    row_max = jnp.max(jnp.abs(a), axis=1, keepdims=True)
    scale = jnp.where(row_max > 0, row_max / 127.0, 1.0).astype(jnp.float32)
    q = jnp.clip(jnp.round(a / scale), -127.0, 127.0).astype(jnp.int8)
    return q, scale


def _pick_block_rows(n, budget_bytes):
    """Largest 128-multiple row tile whose double-buffered int8 a_hat tiles
    (+ bf16 dequant temp + resident hw) fit the VMEM budget."""
    n_pad0 = _round_up(n, LANE)
    for cand in (1024, 512, 256, 128):
        if cand > n_pad0:
            continue
        n_pad = _round_up(n, cand)
        resident = 2 * n_pad * LANE * 2 + (1 << 20)          # hw (bf16) + slack
        need = resident + cand * n_pad * (2 + 2) + 4 * cand * (2 * LANE + 4)
        if need <= budget_bytes:
            return cand
    return 128


# ---------------------------------------------------------------------------
# Kernels
# ---------------------------------------------------------------------------
def gcn_prop_kernel(aq_ref, scale_ref, hw_ref, b_ref, out_ref, *, apply_relu):
    """One GCNConv propagation for one row tile (weight matmul hoisted to XLA).

      aq_ref   : [TM, N]   int8  streamed row tile of quantized a_hat
      scale_ref: [TM, 1]   f32   per-row dequant scale
      hw_ref   : [N, H]    bf16  resident, precomputed h @ W
      b_ref    : [1, H]    f32   bias
      out_ref  : [TM, H]   bf16  output rows

      out = act( (a_tile @ hw) * scale + b )
    """
    y = jnp.dot(aq_ref[...].astype(jnp.bfloat16), hw_ref[...],
                preferred_element_type=jnp.float32)
    y = y * scale_ref[...] + b_ref[...]
    if apply_relu:
        y = jnp.maximum(y, 0.0)
    out_ref[...] = y.astype(out_ref.dtype)


def pool_linear_kernel(pool_ref, h_ref, wl_ref, bl_ref, out_ref, acc_ref):
    """global_mean_pool + (eval-mode dropout = identity) + final Linear.

      pool_ref: [G_pad, TM]    bf16  streamed column tile of the pool matrix
      h_ref   : [TM, H]        bf16  streamed row tile of h3
      wl_ref  : [H, C_pad]     f32   final linear weight (resident)
      bl_ref  : [1, C_pad]     f32   final linear bias
      out_ref : [G_pad, C_pad] f32   logits (resident accumulator output)
      acc_ref : [G_pad, H]     f32   running pooled sums
    """
    i = pl.program_id(0)

    @pl.when(i == 0)
    def _():
        acc_ref[...] = jnp.zeros_like(acc_ref)

    acc_ref[...] += jnp.dot(pool_ref[...], h_ref[...],
                            preferred_element_type=jnp.float32)

    @pl.when(i == pl.num_programs(0) - 1)
    def _():
        # Dropout(p=0.5) is identity in eval mode; apply the final Linear once.
        out_ref[...] = (jnp.dot(acc_ref[...], wl_ref[...],
                                preferred_element_type=jnp.float32)
                        + bl_ref[...])


def gcn_fused_kernel(aq_ref, scale_ref, x_ref, w1_ref, b1_ref, w2_ref, b2_ref,
                     w3_ref, b3_ref, pool_ref, wl_ref, bl_ref, out_ref,
                     h1_ref, h2_ref, *, n_row_tiles, tile_rows):
    """Whole forward with a_hat resident in VMEM (read from HBM exactly once).

      aq_ref   : [N, N]        int8  quantized a_hat (resident)
      scale_ref: [N, 1]        f32   per-row dequant scale
      x_ref    : [N, F]        bf16  node features
      w*_ref   : bf16 conv weights, b*_ref: f32 biases [1, H]
      pool_ref : [G_pad, N]    bf16  mean-pool matrix (pre-transposed layout)
      wl_ref   : [H, C_pad]    f32,  bl_ref: [1, C_pad] f32
      out_ref  : [G_pad, C_pad] f32  logits
      h1_ref/h2_ref: [N, H]    bf16  VMEM scratch activations
    """

    def propagate(h_in, w_ref, b_ref, h_out_ref, apply_relu):
        # Hoist the weight matmul out of the row-tile loop: hw = h @ W.
        hw = jnp.dot(h_in, w_ref[...],
                     preferred_element_type=jnp.float32).astype(jnp.bfloat16)

        @pl.loop(0, n_row_tiles)
        def _(t):
            r = pl.multiple_of(t * tile_rows, tile_rows)
            a_t = aq_ref[pl.ds(r, tile_rows), :].astype(jnp.bfloat16)
            y = jnp.dot(a_t, hw, preferred_element_type=jnp.float32)
            y = y * scale_ref[pl.ds(r, tile_rows), :] + b_ref[...]
            if apply_relu:
                y = jnp.maximum(y, 0.0)
            h_out_ref[pl.ds(r, tile_rows), :] = y.astype(h_out_ref.dtype)

    propagate(x_ref[...], w1_ref, b1_ref, h1_ref, True)     # conv1 + relu
    propagate(h1_ref[...], w2_ref, b2_ref, h2_ref, True)    # conv2 + relu
    propagate(h2_ref[...], w3_ref, b3_ref, h1_ref, False)   # conv3 (h3 reuses h1)

    # global_mean_pool + (eval-mode dropout = identity) + final Linear.
    pooled = jnp.dot(pool_ref[...], h1_ref[...], preferred_element_type=jnp.float32)
    out_ref[...] = (jnp.dot(pooled, wl_ref[...], preferred_element_type=jnp.float32)
                    + bl_ref[...])


# ---------------------------------------------------------------------------
# pallas_call wrappers
# ---------------------------------------------------------------------------
def _gcn_propagate(a_q, a_scale, hw, b, *, apply_relu, block_rows, vmem_limit):
    n_pad = a_q.shape[0]
    h_pad = hw.shape[1]
    grid = (n_pad // block_rows,)

    flops = 2 * n_pad * n_pad * h_pad
    bytes_accessed = int(a_q.size + a_scale.size * 4 + hw.size * 2
                         + b.size * 4 + n_pad * h_pad * 2)

    return pl.pallas_call(
        functools.partial(gcn_prop_kernel, apply_relu=apply_relu),
        out_shape=jax.ShapeDtypeStruct((n_pad, h_pad), jnp.bfloat16),
        grid=grid,
        in_specs=[
            pl.BlockSpec((block_rows, n_pad), lambda i: (i, 0)),   # int8 a_hat rows
            pl.BlockSpec((block_rows, 1), lambda i: (i, 0)),       # row scales
            _full_spec((n_pad, h_pad)),                            # hw resident
            _full_spec((1, h_pad)),                                # bias
        ],
        out_specs=pl.BlockSpec((block_rows, h_pad), lambda i: (i, 0)),
        compiler_params=pltpu.CompilerParams(
            dimension_semantics=("parallel",),
            vmem_limit_bytes=vmem_limit),
        cost_estimate=pl.CostEstimate(flops=int(flops), transcendentals=0,
                                      bytes_accessed=bytes_accessed),
    )(a_q, a_scale, hw, b)


def _pool_linear(pool_p, h3, wl_p, bl_p, *, block_rows, vmem_limit):
    g_pad, n_pad = pool_p.shape
    h_pad = h3.shape[1]
    c_pad = wl_p.shape[1]
    grid = (n_pad // block_rows,)

    flops = 2 * g_pad * n_pad * h_pad + 2 * g_pad * h_pad * c_pad
    bytes_accessed = int(pool_p.size * 2 + h3.size * 2 + wl_p.size * 4
                         + bl_p.size * 4 + g_pad * c_pad * 4)

    return pl.pallas_call(
        pool_linear_kernel,
        out_shape=jax.ShapeDtypeStruct((g_pad, c_pad), jnp.float32),
        grid=grid,
        in_specs=[
            pl.BlockSpec((g_pad, block_rows), lambda i: (0, i)),   # pool col tile
            pl.BlockSpec((block_rows, h_pad), lambda i: (i, 0)),   # h3 row tile
            _full_spec((h_pad, c_pad)),
            _full_spec((1, c_pad)),
        ],
        out_specs=pl.BlockSpec((g_pad, c_pad), lambda i: (0, 0)),  # resident acc
        scratch_shapes=[pltpu.VMEM((g_pad, h_pad), jnp.float32)],
        compiler_params=pltpu.CompilerParams(
            dimension_semantics=("arbitrary",),                    # reduction axis
            vmem_limit_bytes=vmem_limit),
        cost_estimate=pl.CostEstimate(flops=int(flops), transcendentals=0,
                                      bytes_accessed=bytes_accessed),
    )(pool_p, h3, wl_p, bl_p)


def _gcn_fused(a_q, a_scale, x_p, params_p, pool_p, *, vmem_limit):
    (w1_p, b1_p, w2_p, b2_p, w3_p, b3_p, wl_p, bl_p) = params_p
    n_pad = a_q.shape[0]
    f_pad = x_p.shape[1]
    h_pad = w1_p.shape[1]
    g_pad = pool_p.shape[0]
    c_pad = wl_p.shape[1]

    tile_rows = 128
    n_row_tiles = n_pad // tile_rows

    flops = (3 * 2 * n_pad * n_pad * h_pad + 3 * 2 * n_pad * h_pad * h_pad
             + 2 * g_pad * n_pad * h_pad + 2 * g_pad * h_pad * c_pad)
    bytes_accessed = int(a_q.size + a_scale.size * 4 + x_p.size * 2
                         + pool_p.size * 2
                         + (w1_p.size + w2_p.size + w3_p.size) * 2
                         + wl_p.size * 4 + g_pad * c_pad * 4)

    return pl.pallas_call(
        functools.partial(gcn_fused_kernel, n_row_tiles=n_row_tiles,
                          tile_rows=tile_rows),
        out_shape=jax.ShapeDtypeStruct((g_pad, c_pad), jnp.float32),
        grid=(1,),
        in_specs=[
            _full_spec((n_pad, n_pad)),        # a_q (resident, read once)
            _full_spec((n_pad, 1)),            # row scales
            _full_spec((n_pad, f_pad)),        # x
            _full_spec((f_pad, h_pad)), _full_spec((1, h_pad)),   # conv1
            _full_spec((h_pad, h_pad)), _full_spec((1, h_pad)),   # conv2
            _full_spec((h_pad, h_pad)), _full_spec((1, h_pad)),   # conv3
            _full_spec((g_pad, n_pad)),        # pool (pre-transposed layout)
            _full_spec((h_pad, c_pad)), _full_spec((1, c_pad)),   # linear
        ],
        out_specs=pl.BlockSpec((g_pad, c_pad), lambda i: (0, 0)),
        scratch_shapes=[pltpu.VMEM((n_pad, h_pad), jnp.bfloat16),
                        pltpu.VMEM((n_pad, h_pad), jnp.bfloat16)],
        compiler_params=pltpu.CompilerParams(
            dimension_semantics=("arbitrary",),
            vmem_limit_bytes=vmem_limit),
        cost_estimate=pl.CostEstimate(flops=int(flops), transcendentals=0,
                                      bytes_accessed=bytes_accessed),
    )(a_q, a_scale, x_p, w1_p, b1_p, w2_p, b2_p, w3_p, b3_p, pool_p, wl_p, bl_p)


def gcn_forward(a_hat, x, pool, params, *, block_rows=None, force_streaming=False):
    """Eval-mode GCN forward: 3x GCNConv (+relu on 1,2) + mean-pool + Linear."""
    (w1, b1, w2, b2, w3, b3, wl, bl) = params
    n = x.shape[0]
    c = wl.shape[1]
    g = pool.shape[0]

    vmem_cap = _vmem_capacity_bytes()
    vmem_limit = int(0.9 * vmem_cap)
    budget = int(0.7 * vmem_cap)

    if block_rows is None:
        block_rows = _pick_block_rows(n, budget)
    assert block_rows % 128 == 0, "row tiles must be multiples of 128 (bf16 stores)"

    n_pad = _round_up(n, block_rows)
    f_pad = _round_up(x.shape[1], LANE)
    h_pad = _round_up(w1.shape[1], LANE)
    c_pad = _round_up(c, LANE)
    g_pad = _round_up(g, 8)

    def pad2(m, rows, cols):
        return jnp.pad(m, ((0, rows - m.shape[0]), (0, cols - m.shape[1])))

    # Quantize the only O(N^2) operand to int8 with per-row scales.
    a_pad = pad2(a_hat.astype(jnp.float32), n_pad, n_pad)
    a_q, a_scale = _quantize_rows_int8(a_pad)

    x_p = pad2(x, n_pad, f_pad).astype(jnp.bfloat16)
    w1_p = pad2(w1, f_pad, h_pad).astype(jnp.bfloat16)
    w2_p = pad2(w2, h_pad, h_pad).astype(jnp.bfloat16)
    w3_p = pad2(w3, h_pad, h_pad).astype(jnp.bfloat16)
    b1_p = pad2(b1, 1, h_pad).astype(jnp.float32)
    b2_p = pad2(b2, 1, h_pad).astype(jnp.float32)
    b3_p = pad2(b3, 1, h_pad).astype(jnp.float32)
    wl_p = pad2(wl, h_pad, c_pad).astype(jnp.float32)   # final linear stays f32
    bl_p = pad2(bl, 1, c_pad).astype(jnp.float32)
    pool_p = pad2(pool, g_pad, n_pad).astype(jnp.bfloat16)   # [G_pad, N]: no transpose

    params_p = (w1_p, b1_p, w2_p, b2_p, w3_p, b3_p, wl_p, bl_p)

    # Read-once fusion if a_hat (int8) + scratch fits VMEM (conservative: assume
    # Pallas may double-buffer the resident input block).
    fused_need = 2 * n_pad * n_pad + 2400 * n_pad + (2 << 20)
    use_fused = (not force_streaming) and (fused_need <= budget)

    if use_fused:
        logits_p = _gcn_fused(a_q, a_scale, x_p, params_p, pool_p,
                              vmem_limit=vmem_limit)
    else:
        # Streaming path: hoist hw = h @ W to XLA (tiny [N,128]x[128,128] matmuls),
        # stream int8 a_hat row tiles per layer.
        def mm(h, w):
            return jnp.dot(h, w, preferred_element_type=jnp.float32).astype(jnp.bfloat16)

        h = x_p
        for (w_p, b_p, relu) in ((w1_p, b1_p, True),
                                 (w2_p, b2_p, True),
                                 (w3_p, b3_p, False)):
            hw = mm(h, w_p)
            h = _gcn_propagate(a_q, a_scale, hw, b_p, apply_relu=relu,
                               block_rows=block_rows, vmem_limit=vmem_limit)
        logits_p = _pool_linear(pool_p, h, wl_p, bl_p,
                                block_rows=block_rows, vmem_limit=vmem_limit)

    return logits_p[:g, :c]


# ---------------------------------------------------------------------------
# Host-side glue (plain JAX): dense normalized adjacency + mean-pool matrix
# ---------------------------------------------------------------------------
def build_normalized_adjacency(edge_index, num_nodes):
    """Dense D^{-1/2}(A+I)D^{-1/2} from a [2, E] edge index (self loops deduped)."""
    src, dst = edge_index[0], edge_index[1]
    a = jnp.zeros((num_nodes, num_nodes), jnp.float32)
    a = a.at[src, dst].set(1.0)
    a = a.at[dst, src].set(1.0)                              # undirected
    a = jnp.where(jnp.eye(num_nodes, dtype=bool), 1.0, a)    # self loops (deduped)
    deg = a.sum(axis=1)
    d_inv_sqrt = jnp.where(deg > 0, lax.rsqrt(deg), 0.0)
    return a * d_inv_sqrt[:, None] * d_inv_sqrt[None, :]


def build_mean_pool_matrix(batch, num_graphs):
    """[G, N] matrix so that pool @ x == global_mean_pool(x, batch)."""
    one_hot = (batch[None, :] == jnp.arange(num_graphs)[:, None]).astype(jnp.float32)
    counts = one_hot.sum(axis=1, keepdims=True)
    return one_hot / jnp.maximum(counts, 1.0)


if __name__ == "__main__":
    # Two ring graphs of 100 nodes each (small, deterministic).
    NODES_PER_GRAPH, NUM_GRAPHS = 100, 2
    N = NODES_PER_GRAPH * NUM_GRAPHS
    F_IN, HID, C = 8, 32, 4

    key = jax.random.PRNGKey(0)
    k = jax.random.split(key, 8)

    x = jax.random.normal(k[0], (N, F_IN), jnp.float32)

    edge_chunks = []
    for gidx in range(NUM_GRAPHS):
        base = gidx * NODES_PER_GRAPH
        loc = jnp.arange(NODES_PER_GRAPH)
        edge_chunks.append(jnp.stack([loc + base, (loc + 1) % NODES_PER_GRAPH + base]))
    edge_index = jnp.concatenate(edge_chunks, axis=1)              # [2, 200]
    batch = jnp.repeat(jnp.arange(NUM_GRAPHS, dtype=jnp.int32), NODES_PER_GRAPH)

    a_hat = build_normalized_adjacency(edge_index, N)
    pool = build_mean_pool_matrix(batch, NUM_GRAPHS)

    def glorot(rng, shape):
        fan_in, fan_out = shape
        lim = jnp.sqrt(6.0 / (fan_in + fan_out))
        return jax.random.uniform(rng, shape, jnp.float32, -lim, lim)

    w1 = glorot(k[1], (F_IN, HID)); b1 = jnp.zeros((1, HID), jnp.float32)
    w2 = glorot(k[2], (HID, HID));  b2 = jnp.zeros((1, HID), jnp.float32)
    w3 = glorot(k[3], (HID, HID));  b3 = jnp.zeros((1, HID), jnp.float32)
    wl = glorot(k[4], (HID, C))
    bl = jax.random.uniform(k[5], (1, C), jnp.float32,
                            -1.0 / jnp.sqrt(HID), 1.0 / jnp.sqrt(HID))
    params = (w1, b1, w2, b2, w3, b3, wl, bl)

    # Pure-JAX f32 reference (eval mode: dropout is identity).
    h = jnp.maximum(a_hat @ (x @ w1) + b1, 0.0)
    h = jnp.maximum(a_hat @ (h @ w2) + b2, 0.0)
    h = a_hat @ (h @ w3) + b3
    ref = (pool @ h) @ wl + bl

    # 1) default path: a_hat fits VMEM -> fused read-once kernel.
    out_fused = gcn_forward(a_hat, x, pool, params)
    # 2) forced streaming path with 128-row tiles (exercises the multi-tile grid
    #    + resident pool/linear accumulator used for large graphs).
    out_stream = gcn_forward(a_hat, x, pool, params,
                             block_rows=128, force_streaming=True)
    out_fused, out_stream = jax.block_until_ready((out_fused, out_stream))

    assert out_fused.shape == (NUM_GRAPHS, C)
    assert out_stream.shape == (NUM_GRAPHS, C)
    # int8 a_hat + bf16 activations -> loosened tolerance vs the f32 reference.
    err_f = float(jnp.max(jnp.abs(out_fused - ref)))
    err_s = float(jnp.max(jnp.abs(out_stream - ref)))
    assert jnp.allclose(out_fused, ref, atol=7.5e-2, rtol=5e-2), err_f
    assert jnp.allclose(out_stream, ref, atol=7.5e-2, rtol=5e-2), err_s

    print("KERNEL_OK")
</pallas_src>

<mosaic_0001>
module attributes {stable_mosaic.version = 11 : i64} {
  func.func @gcn_fused_kernel(%arg0: i32, %arg1: memref<256x256xi8, #tpu.memory_space<vmem>>, %arg2: memref<256x1xf32, #tpu.memory_space<vmem>>, %arg3: memref<256x128xbf16, #tpu.memory_space<vmem>>, %arg4: memref<128x128xbf16, #tpu.memory_space<vmem>>, %arg5: memref<1x128xf32, #tpu.memory_space<vmem>>, %arg6: memref<128x128xbf16, #tpu.memory_space<vmem>>, %arg7: memref<1x128xf32, #tpu.memory_space<vmem>>, %arg8: memref<128x128xbf16, #tpu.memory_space<vmem>>, %arg9: memref<1x128xf32, #tpu.memory_space<vmem>>, %arg10: memref<8x256xbf16, #tpu.memory_space<vmem>>, %arg11: memref<128x128xf32, #tpu.memory_space<vmem>>, %arg12: memref<1x128xf32, #tpu.memory_space<vmem>>, %arg13: memref<8x128xf32, #tpu.memory_space<vmem>>, %arg14: memref<256x128xbf16, #tpu.memory_space<vmem>>, %arg15: memref<256x128xbf16, #tpu.memory_space<vmem>>) attributes {dimension_semantics = [#tpu.dimension_semantics<arbitrary>], iteration_bounds = array<i64: 1>, scalar_prefetch = 0 : i64, scratch_operands = 2 : i64, tpu.core_type = #tpu.core_type<tc>, window_params = [{pipeline_mode = #tpu.pipeline_mode<synchronous>, transform_indices = @transform_0, window_bounds = array<i64: 256, 256>}, {pipeline_mode = #tpu.pipeline_mode<synchronous>, transform_indices = @transform_1, window_bounds = array<i64: 256, 1>}, {pipeline_mode = #tpu.pipeline_mode<synchronous>, transform_indices = @transform_2, window_bounds = array<i64: 256, 128>}, {pipeline_mode = #tpu.pipeline_mode<synchronous>, transform_indices = @transform_3, window_bounds = array<i64: 128, 128>}, {pipeline_mode = #tpu.pipeline_mode<synchronous>, transform_indices = @transform_4, window_bounds = array<i64: 1, 128>}, {pipeline_mode = #tpu.pipeline_mode<synchronous>, transform_indices = @transform_5, window_bounds = array<i64: 128, 128>}, {pipeline_mode = #tpu.pipeline_mode<synchronous>, transform_indices = @transform_6, window_bounds = array<i64: 1, 128>}, {pipeline_mode = #tpu.pipeline_mode<synchronous>, transform_indices = @transform_7, window_bounds = array<i64: 128, 128>}, {pipeline_mode = #tpu.pipeline_mode<synchronous>, transform_indices = @transform_8, window_bounds = array<i64: 1, 128>}, {pipeline_mode = #tpu.pipeline_mode<synchronous>, transform_indices = @transform_9, window_bounds = array<i64: 8, 256>}, {pipeline_mode = #tpu.pipeline_mode<synchronous>, transform_indices = @transform_10, window_bounds = array<i64: 128, 128>}, {pipeline_mode = #tpu.pipeline_mode<synchronous>, transform_indices = @transform_11, window_bounds = array<i64: 1, 128>}, {pipeline_mode = #tpu.pipeline_mode<synchronous>, transform_indices = @transform_12, window_bounds = array<i64: 8, 128>}]} {
    %c0 = arith.constant 0 : index
    %c0_0 = arith.constant 0 : index
    %0 = vector.load %arg3[%c0, %c0_0] : memref<256x128xbf16, #tpu.memory_space<vmem>>, vector<256x128xbf16>
    %c0_1 = arith.constant 0 : index
    %c0_2 = arith.constant 0 : index
    %1 = vector.load %arg4[%c0_1, %c0_2] : memref<128x128xbf16, #tpu.memory_space<vmem>>, vector<128x128xbf16>
    %cst = arith.constant dense<0.000000e+00> : vector<256x128xf32>
    %2 = tpu.matmul %0, %1, %cst {dimension_numbers = #tpu.dot_dimension_numbers<[1], [0], [0], [1], [0, 0, 1, 1], [], []>} : vector<256x128xbf16>, vector<128x128xbf16>, vector<256x128xf32> -> vector<256x128xf32>
    %3 = arith.truncf %2 : vector<256x128xf32> to vector<256x128xbf16>
    %c0_i32 = arith.constant 0 : i32
    %c2_i32 = arith.constant 2 : i32
    %4 = arith.addi %c0_i32, %c2_i32 : i32
    %c1_i32 = arith.constant 1 : i32
    scf.for %arg16 = %c0_i32 to %4 step %c1_i32  : i32 {
      %c1_i32_34 = arith.constant 1 : i32
      %24 = arith.muli %arg16, %c1_i32_34 : i32
      %c0_i32_35 = arith.constant 0 : i32
      %25 = arith.addi %c0_i32_35, %24 : i32
      %c128_i32 = arith.constant 128 : i32
      %26 = arith.muli %25, %c128_i32 : i32
      %27 = tpu.assume_multiple %26, 128 : i32
      %28 = arith.index_cast %27 : i32 to index
      %c0_36 = arith.constant 0 : index
      %29 = vector.load %arg1[%28, %c0_36] : memref<256x256xi8, #tpu.memory_space<vmem>>, vector<128x256xi8>
      %30 = arith.sitofp %29 : vector<128x256xi8> to vector<128x256xbf16>
      %cst_37 = arith.constant dense<0.000000e+00> : vector<128x128xf32>
      %31 = tpu.matmul %30, %3, %cst_37 {dimension_numbers = #tpu.dot_dimension_numbers<[1], [0], [0], [1], [0, 0, 1, 1], [], []>} : vector<128x256xbf16>, vector<256x128xbf16>, vector<128x128xf32> -> vector<128x128xf32>
      %32 = arith.index_cast %27 : i32 to index
      %c0_38 = arith.constant 0 : index
      %33 = vector.load %arg2[%32, %c0_38] : memref<256x1xf32, #tpu.memory_space<vmem>>, vector<128x1xf32>
      %34 = vector.broadcast %33 : vector<128x1xf32> to vector<128x128xf32>
      %35 = arith.mulf %31, %34 : vector<128x128xf32>
      %c0_39 = arith.constant 0 : index
      %c0_40 = arith.constant 0 : index
      %36 = vector.load %arg5[%c0_39, %c0_40] : memref<1x128xf32, #tpu.memory_space<vmem>>, vector<1x128xf32>
      %37 = vector.broadcast %36 : vector<1x128xf32> to vector<128x128xf32>
      %38 = arith.addf %35, %37 : vector<128x128xf32>
      %cst_41 = arith.constant 0.000000e+00 : f32
      %39 = vector.broadcast %cst_41 : f32 to vector<128x128xf32>
      %40 = arith.maximumf %38, %39 : vector<128x128xf32>
      %41 = arith.truncf %40 : vector<128x128xf32> to vector<128x128xbf16>
      %42 = arith.index_cast %27 : i32 to index
      %c0_42 = arith.constant 0 : index
      %43 = vector.load %arg14[%42, %c0_42] : memref<256x128xbf16, #tpu.memory_space<vmem>>, vector<128x128xbf16>
      tpu.vector_store %arg14[%42, %c0_42], %41 {strides = array<i32>} : memref<256x128xbf16, #tpu.memory_space<vmem>>, vector<128x128xbf16>,
    }
    %c2_i32_3 = arith.constant 2 : i32
    %c0_4 = arith.constant 0 : index
    %c0_5 = arith.constant 0 : index
    %5 = vector.load %arg14[%c0_4, %c0_5] : memref<256x128xbf16, #tpu.memory_space<vmem>>, vector<256x128xbf16>
    %c0_6 = arith.constant 0 : index
    %c0_7 = arith.constant 0 : index
    %6 = vector.load %arg6[%c0_6, %c0_7] : memref<128x128xbf16, #tpu.memory_space<vmem>>, vector<128x128xbf16>
    %cst_8 = arith.constant dense<0.000000e+00> : vector<256x128xf32>
    %7 = tpu.matmul %5, %6, %cst_8 {dimension_numbers = #tpu.dot_dimension_numbers<[1], [0], [0], [1], [0, 0, 1, 1], [], []>} : vector<256x128xbf16>, vector<128x128xbf16>, vector<256x128xf32> -> vector<256x128xf32>
    %8 = arith.truncf %7 : vector<256x128xf32> to vector<256x128xbf16>
    %c0_i32_9 = arith.constant 0 : i32
    %c2_i32_10 = arith.constant 2 : i32
    %9 = arith.addi %c0_i32_9, %c2_i32_10 : i32
    %c1_i32_11 = arith.constant 1 : i32
    scf.for %arg16 = %c0_i32_9 to %9 step %c1_i32_11  : i32 {
      %c1_i32_34 = arith.constant 1 : i32
      %24 = arith.muli %arg16, %c1_i32_34 : i32
      %c0_i32_35 = arith.constant 0 : i32
      %25 = arith.addi %c0_i32_35, %24 : i32
      %c128_i32 = arith.constant 128 : i32
      %26 = arith.muli %25, %c128_i32 : i32
      %27 = tpu.assume_multiple %26, 128 : i32
      %28 = arith.index_cast %27 : i32 to index
      %c0_36 = arith.constant 0 : index
      %29 = vector.load %arg1[%28, %c0_36] : memref<256x256xi8, #tpu.memory_space<vmem>>, vector<128x256xi8>
      %30 = arith.sitofp %29 : vector<128x256xi8> to vector<128x256xbf16>
      %cst_37 = arith.constant dense<0.000000e+00> : vector<128x128xf32>
      %31 = tpu.matmul %30, %8, %cst_37 {dimension_numbers = #tpu.dot_dimension_numbers<[1], [0], [0], [1], [0, 0, 1, 1], [], []>} : vector<128x256xbf16>, vector<256x128xbf16>, vector<128x128xf32> -> vector<128x128xf32>
      %32 = arith.index_cast %27 : i32 to index
      %c0_38 = arith.constant 0 : index
      %33 = vector.load %arg2[%32, %c0_38] : memref<256x1xf32, #tpu.memory_space<vmem>>, vector<128x1xf32>
      %34 = vector.broadcast %33 : vector<128x1xf32> to vector<128x128xf32>
      %35 = arith.mulf %31, %34 : vector<128x128xf32>
      %c0_39 = arith.constant 0 : index
      %c0_40 = arith.constant 0 : index
      %36 = vector.load %arg7[%c0_39, %c0_40] : memref<1x128xf32, #tpu.memory_space<vmem>>, vector<1x128xf32>
      %37 = vector.broadcast %36 : vector<1x128xf32> to vector<128x128xf32>
      %38 = arith.addf %35, %37 : vector<128x128xf32>
      %cst_41 = arith.constant 0.000000e+00 : f32
      %39 = vector.broadcast %cst_41 : f32 to vector<128x128xf32>
      %40 = arith.maximumf %38, %39 : vector<128x128xf32>
      %41 = arith.truncf %40 : vector<128x128xf32> to vector<128x128xbf16>
      %42 = arith.index_cast %27 : i32 to index
      %c0_42 = arith.constant 0 : index
      %43 = vector.load %arg15[%42, %c0_42] : memref<256x128xbf16, #tpu.memory_space<vmem>>, vector<128x128xbf16>
      tpu.vector_store %arg15[%42, %c0_42], %41 {strides = array<i32>} : memref<256x128xbf16, #tpu.memory_space<vmem>>, vector<128x128xbf16>,
    }
    %c2_i32_12 = arith.constant 2 : i32
    %c0_13 = arith.constant 0 : index
    %c0_14 = arith.constant 0 : index
    %10 = vector.load %arg15[%c0_13, %c0_14] : memref<256x128xbf16, #tpu.memory_space<vmem>>, vector<256x128xbf16>
    %c0_15 = arith.constant 0 : index
    %c0_16 = arith.constant 0 : index
    %11 = vector.load %arg8[%c0_15, %c0_16] : memref<128x128xbf16, #tpu.memory_space<vmem>>, vector<128x128xbf16>
    %cst_17 = arith.constant dense<0.000000e+00> : vector<256x128xf32>
    %12 = tpu.matmul %10, %11, %cst_17 {dimension_numbers = #tpu.dot_dimension_numbers<[1], [0], [0], [1], [0, 0, 1, 1], [], []>} : vector<256x128xbf16>, vector<128x128xbf16>, vector<256x128xf32> -> vector<256x128xf32>
    %13 = arith.truncf %12 : vector<256x128xf32> to vector<256x128xbf16>
    %c0_i32_18 = arith.constant 0 : i32
    %c2_i32_19 = arith.constant 2 : i32
    %14 = arith.addi %c0_i32_18, %c2_i32_19 : i32
    %c1_i32_20 = arith.constant 1 : i32
    scf.for %arg16 = %c0_i32_18 to %14 step %c1_i32_20  : i32 {
      %c1_i32_34 = arith.constant 1 : i32
      %24 = arith.muli %arg16, %c1_i32_34 : i32
      %c0_i32_35 = arith.constant 0 : i32
      %25 = arith.addi %c0_i32_35, %24 : i32
      %c128_i32 = arith.constant 128 : i32
      %26 = arith.muli %25, %c128_i32 : i32
      %27 = tpu.assume_multiple %26, 128 : i32
      %28 = arith.index_cast %27 : i32 to index
      %c0_36 = arith.constant 0 : index
      %29 = vector.load %arg1[%28, %c0_36] : memref<256x256xi8, #tpu.memory_space<vmem>>, vector<128x256xi8>
      %30 = arith.sitofp %29 : vector<128x256xi8> to vector<128x256xbf16>
      %cst_37 = arith.constant dense<0.000000e+00> : vector<128x128xf32>
      %31 = tpu.matmul %30, %13, %cst_37 {dimension_numbers = #tpu.dot_dimension_numbers<[1], [0], [0], [1], [0, 0, 1, 1], [], []>} : vector<128x256xbf16>, vector<256x128xbf16>, vector<128x128xf32> -> vector<128x128xf32>
      %32 = arith.index_cast %27 : i32 to index
      %c0_38 = arith.constant 0 : index
      %33 = vector.load %arg2[%32, %c0_38] : memref<256x1xf32, #tpu.memory_space<vmem>>, vector<128x1xf32>
      %34 = vector.broadcast %33 : vector<128x1xf32> to vector<128x128xf32>
      %35 = arith.mulf %31, %34 : vector<128x128xf32>
      %c0_39 = arith.constant 0 : index
      %c0_40 = arith.constant 0 : index
      %36 = vector.load %arg9[%c0_39, %c0_40] : memref<1x128xf32, #tpu.memory_space<vmem>>, vector<1x128xf32>
      %37 = vector.broadcast %36 : vector<1x128xf32> to vector<128x128xf32>
      %38 = arith.addf %35, %37 : vector<128x128xf32>
      %39 = arith.truncf %38 : vector<128x128xf32> to vector<128x128xbf16>
      %40 = arith.index_cast %27 : i32 to index
      %c0_41 = arith.constant 0 : index
      %41 = vector.load %arg14[%40, %c0_41] : memref<256x128xbf16, #tpu.memory_space<vmem>>, vector<128x128xbf16>
      tpu.vector_store %arg14[%40, %c0_41], %39 {strides = array<i32>} : memref<256x128xbf16, #tpu.memory_space<vmem>>, vector<128x128xbf16>,
    }
    %c2_i32_21 = arith.constant 2 : i32
    %c0_22 = arith.constant 0 : index
    %c0_23 = arith.constant 0 : index
    %15 = vector.load %arg10[%c0_22, %c0_23] : memref<8x256xbf16, #tpu.memory_space<vmem>>, vector<8x256xbf16>
    %c0_24 = arith.constant 0 : index
    %c0_25 = arith.constant 0 : index
    %16 = vector.load %arg14[%c0_24, %c0_25] : memref<256x128xbf16, #tpu.memory_space<vmem>>, vector<256x128xbf16>
    %cst_26 = arith.constant dense<0.000000e+00> : vector<8x128xf32>
    %17 = tpu.matmul %15, %16, %cst_26 {dimension_numbers = #tpu.dot_dimension_numbers<[1], [0], [0], [1], [0, 0, 1, 1], [], []>} : vector<8x256xbf16>, vector<256x128xbf16>, vector<8x128xf32> -> vector<8x128xf32>
    %c0_27 = arith.constant 0 : index
    %c0_28 = arith.constant 0 : index
    %18 = vector.load %arg11[%c0_27, %c0_28] : memref<128x128xf32, #tpu.memory_space<vmem>>, vector<128x128xf32>
    %cst_29 = arith.constant dense<0.000000e+00> : vector<8x128xf32>
    %19 = tpu.matmul %17, %18, %cst_29 {dimension_numbers = #tpu.dot_dimension_numbers<[1], [0], [0], [1], [0, 0, 1, 1], [], []>} : vector<8x128xf32>, vector<128x128xf32>, vector<8x128xf32> -> vector<8x128xf32>
    %c0_30 = arith.constant 0 : index
    %c0_31 = arith.constant 0 : index
    %20 = vector.load %arg12[%c0_30, %c0_31] : memref<1x128xf32, #tpu.memory_space<vmem>>, vector<1x128xf32>
    %21 = vector.broadcast %20 : vector<1x128xf32> to vector<8x128xf32>
    %22 = arith.addf %19, %21 : vector<8x128xf32>
    %c0_32 = arith.constant 0 : index
    %c0_33 = arith.constant 0 : index
    %23 = vector.load %arg13[%c0_32, %c0_33] : memref<8x128xf32, #tpu.memory_space<vmem>>, vector<8x128xf32>
    tpu.vector_store %arg13[%c0_32, %c0_33], %22 {strides = array<i32>} : memref<8x128xf32, #tpu.memory_space<vmem>>, vector<8x128xf32>,
    return
  }
  func.func @transform_0(%arg0: i32) -> (i32, i32) {
    %c0_i32 = arith.constant 0 : i32
    %c0_i32_0 = arith.constant 0 : i32
    %c0_i32_1 = arith.constant 0 : i32
    return %c0_i32, %c0_i32_0 : i32, i32
  }
  func.func @transform_1(%arg0: i32) -> (i32, i32) {
    %c0_i32 = arith.constant 0 : i32
    %c0_i32_0 = arith.constant 0 : i32
    %c0_i32_1 = arith.constant 0 : i32
    return %c0_i32, %c0_i32_0 : i32, i32
  }
  func.func @transform_2(%arg0: i32) -> (i32, i32) {
    %c0_i32 = arith.constant 0 : i32
    %c0_i32_0 = arith.constant 0 : i32
    %c0_i32_1 = arith.constant 0 : i32
    return %c0_i32, %c0_i32_0 : i32, i32
  }
  func.func @transform_3(%arg0: i32) -> (i32, i32) {
    %c0_i32 = arith.constant 0 : i32
    %c0_i32_0 = arith.constant 0 : i32
    %c0_i32_1 = arith.constant 0 : i32
    return %c0_i32, %c0_i32_0 : i32, i32
  }
  func.func @transform_4(%arg0: i32) -> (i32, i32) {
    %c0_i32 = arith.constant 0 : i32
    %c0_i32_0 = arith.constant 0 : i32
    %c0_i32_1 = arith.constant 0 : i32
    return %c0_i32, %c0_i32_0 : i32, i32
  }
  func.func @transform_5(%arg0: i32) -> (i32, i32) {
    %c0_i32 = arith.constant 0 : i32
    %c0_i32_0 = arith.constant 0 : i32
    %c0_i32_1 = arith.constant 0 : i32
    return %c0_i32, %c0_i32_0 : i32, i32
  }
  func.func @transform_6(%arg0: i32) -> (i32, i32) {
    %c0_i32 = arith.constant 0 : i32
    %c0_i32_0 = arith.constant 0 : i32
    %c0_i32_1 = arith.constant 0 : i32
    return %c0_i32, %c0_i32_0 : i32, i32
  }
  func.func @transform_7(%arg0: i32) -> (i32, i32) {
    %c0_i32 = arith.constant 0 : i32
    %c0_i32_0 = arith.constant 0 : i32
    %c0_i32_1 = arith.constant 0 : i32
    return %c0_i32, %c0_i32_0 : i32, i32
  }
  func.func @transform_8(%arg0: i32) -> (i32, i32) {
    %c0_i32 = arith.constant 0 : i32
    %c0_i32_0 = arith.constant 0 : i32
    %c0_i32_1 = arith.constant 0 : i32
    return %c0_i32, %c0_i32_0 : i32, i32
  }
  func.func @transform_9(%arg0: i32) -> (i32, i32) {
    %c0_i32 = arith.constant 0 : i32
    %c0_i32_0 = arith.constant 0 : i32
    %c0_i32_1 = arith.constant 0 : i32
    return %c0_i32, %c0_i32_0 : i32, i32
  }
  func.func @transform_10(%arg0: i32) -> (i32, i32) {
    %c0_i32 = arith.constant 0 : i32
    %c0_i32_0 = arith.constant 0 : i32
    %c0_i32_1 = arith.constant 0 : i32
    return %c0_i32, %c0_i32_0 : i32, i32
  }
  func.func @transform_11(%arg0: i32) -> (i32, i32) {
    %c0_i32 = arith.constant 0 : i32
    %c0_i32_0 = arith.constant 0 : i32
    %c0_i32_1 = arith.constant 0 : i32
    return %c0_i32, %c0_i32_0 : i32, i32
  }
  func.func @transform_12(%arg0: i32) -> (i32, i32) {
    %c0_i32 = arith.constant 0 : i32
    %c0_i32_0 = arith.constant 0 : i32
    %c0_i32_1 = arith.constant 0 : i32
    return %c0_i32, %c0_i32_0 : i32, i32
  }
}

</mosaic_0001>

<bundles_post_ra>
// kernel: tpu_custom_call.1
= control target key start
LH: loop header
LB: loop body
LE: loop exit
PB: predicated region body
PF: predicated region fallthrough
CT: control target
= control target key end

     0   :  { %17 = vsyncpa [#allocation5], 0  ;;  %s4436_s0 = inlined_call_operand.vmem [shape: s8[256,256], index: 0, kind: input, shape index: {}]   ;;  %s4437_s1 = inlined_call_operand.vmem [shape: f32[256,1], index: 1, kind: input, shape index: {}]   ;;  %s4438_s2 = inlined_call_operand.vmem [shape: bf16[256,128], index: 2, kind: input, shape index: {}]   ;;  %s4439_s3 = inlined_call_operand.hbm [shape: bf16[128,128], index: 3, kind: input, shape index: {}]   ;;  %s4440_s4 = inlined_call_operand.vmem [shape: f32[1,128], index: 4, kind: input, shape index: {}]   ;;  %s4441_s5 = inlined_call_operand.hbm [shape: bf16[128,128], index: 5, kind: input, shape index: {}]   ;;  %s4442_s6 = inlined_call_operand.vmem [shape: f32[1,128], index: 6, kind: input, shape index: {}]   ;;  %s4443_s7 = inlined_call_operand.hbm [shape: bf16[128,128], index: 7, kind: input, shape index: {}]   ;;  %s4444_s8 = inlined_call_operand.vmem [shape: f32[1,128], index: 8, kind: input, shape index: {}]   ;;  %s4445_s9 = inlined_call_operand.vmem [shape: bf16[8,256], index: 9, kind: input, shape index: {}]   ;;  %s4446_s10 = inlined_call_operand.hbm [shape: f32[128,128], index: 10, kind: input, shape index: {}]   ;;  %s4447_s11 = inlined_call_operand.vmem [shape: f32[1,128], index: 11, kind: input, shape index: {}]   ;;  %s4448_s12 = inlined_call_operand.hbm [shape: f32[8,128], index: 12, kind: output, shape index: {}]  }
   0x1   :  { %18 = vsyncpa [#allocation8], 0 }
   0x2   :  { %19 = vsyncpa [#allocation11], 0 }
   0x3   :  { %20 = vsyncpa [#allocation6], 0  ;;  %s3806_s21 = smov [#allocation7]   ;;  %s3807_s23 = smov [#allocation4]  }
   0x4   :  { %s46_s22 = sshll.u32 %s3806_s21, 4  ;;  %s32_s24 = sshll.u32 %s3807_s23, 4  ;;  %s47_s22 = int_to_ptr.vmem [resolvable:$true] %s46_s22  ;;  %s33_s24 = int_to_ptr.vmem [resolvable:$true] %s32_s24 }
   0x5   :  { %s3682_s25 = scalar_lea.vmem %s47_s22, 1024  ;;  %p3687_p1 = scmp.lt.s32.totalorder %s47_s22, %s47_s22 }
   0x6   :  { %p3683_p0 = scmp.ne.s32.totalorder %s47_s22, %s3682_s25  ;;  %p3688_p2 = scmp.lt.s32.totalorder %s3682_s25, %s3682_s25 }
   0x8   :  { %p3689_p3 = por %p3688_p2, %p3687_p1 }
   0xa   :  { %p3690_p4 = pnand %p3689_p3, %p3683_p0 }
   0xc   :  { %3693 = shalt.err (!%p3690_p4)
}
   0xd   :  { %s3808_s26 = smov 64   ;;  %s3809_s27 = smov 4  }
   0xe   :  { %52 = dma.hbm_to_vmem [thread:$0]  %s4441_s5, 1024, %s47_s22, [#allocation8], %s3808_s26, %s3808_s26, %s3809_s27  }
   0xf   :  { %s3702_s30 = scalar_lea.vmem %s33_s24, 1024  ;;  %p3707_p6 = scmp.lt.s32.totalorder %s33_s24, %s33_s24 }
  0x10   :  { %p3703_p5 = scmp.ne.s32.totalorder %s33_s24, %s3702_s30  ;;  %p3708_p7 = scmp.lt.s32.totalorder %s3702_s30, %s3702_s30 }
  0x12   :  { %p3709_p8 = por %p3708_p7, %p3707_p6 }
  0x14   :  { %p3710_p9 = pnand %p3709_p8, %p3703_p5 }
  0x16   :  { %3713 = shalt.err (!%p3710_p9)
}
  0x17   :  { %38 = dma.hbm_to_vmem [thread:$0]  %s4439_s3, 1024, %s33_s24, [#allocation5], %s3808_s26, %s3808_s26, %s3809_s27  }
  0x18   :  { %s3810_s15 = smov [#allocation9]   ;;  %s3811_s17 = smov [#allocation10]  }
  0x19   :  { %s60_s16 = sshll.u32 %s3810_s15, 4  ;;  %s76_s18 = sshll.u32 %s3811_s17, 4  ;;  %s61_s16 = int_to_ptr.vmem [resolvable:$true] %s60_s16  ;;  %s77_s18 = int_to_ptr.vmem [resolvable:$true] %s76_s18 }
  0x1a   :  { %s3722_s19 = scalar_lea.vmem %s61_s16, 1024  ;;  %p3727_p11 = scmp.lt.s32.totalorder %s61_s16, %s61_s16 }
  0x1b   :  { %p3723_p10 = scmp.ne.s32.totalorder %s61_s16, %s3722_s19  ;;  %p3728_p12 = scmp.lt.s32.totalorder %s3722_s19, %s3722_s19 }
  0x1d   :  { %p3729_p13 = por %p3728_p12, %p3727_p11 }
  0x1f   :  { %p3730_p0 = pnand %p3729_p13, %p3723_p10 }
  0x21   :  { %3733 = shalt.err (!%p3730_p0)
}
  0x22   :  { %66 = dma.hbm_to_vmem [thread:$0]  %s4443_s7, 1024, %s61_s16, [#allocation8], %s3808_s26, %s3808_s26, %s3809_s27  }
  0x23   :  { %s3742_s21 = scalar_lea.vmem %s77_s18, 2048  ;;  %p3747_p2 = scmp.lt.s32.totalorder %s77_s18, %s77_s18 }
  0x24   :  { %p3743_p1 = scmp.ne.s32.totalorder %s77_s18, %s3742_s21  ;;  %p3748_p3 = scmp.lt.s32.totalorder %s3742_s21, %s3742_s21 }
  0x26   :  { %p3749_p4 = por %p3748_p3, %p3747_p2 }
  0x28   :  { %p3750_p5 = pnand %p3749_p4, %p3743_p1 }
  0x2a   :  { %3753 = shalt.err (!%p3750_p5)
}
  0x2b   :  { %s3812_s3 = smov 128   ;;  %s3813_s22 = smov 8  }
  0x2c   :  { %82 = dma.hbm_to_vmem [thread:$0]  %s4446_s10, 2048, %s77_s18, [#allocation11], %s3812_s3, %s3812_s3, %s3813_s22  }
  0x2d   :  { %3786 = dma.done.wait [#allocation5], 1024  }
  0x2e   :  { %3787 = vsyncadd [#allocation5], 4294966272 }
  0x2f   :  { %3788 = dma.done.wait [#allocation8], 2048  }
  0x30   :  { %3789 = vsyncadd [#allocation8], 4294965248 }
  0x31   :  { %3790 = dma.done.wait [#allocation11], 2048  }
  0x32   :  { %3791 = vsyncadd [#allocation11], 4294965248  ;;  %v3578_v0 = vld [vmem:[#allocation4 + $0x38] sm:$0xff]   ;;  %v3579_v1 = vld [vmem:[#allocation4 + $0x30] sm:$0xff]  }
  0x33   :  { %3265 = vmatprep.subr.bf16.mxu0 %v3578_v0  ;;  %3444 = vmatprep.subr.bf16.mxu1 %v3578_v0  ;;  %v3580_v2 = vld [vmem:[#allocation4 + $0x28] sm:$0xff]   ;;  %v3581_v3 = vld [vmem:[#allocation4 + $0x20] sm:$0xff]   ;;  %v3582_v6 = vld [vmem:[#allocation4 + $0x18] sm:$0xff]  }
  0x34   :  { %3266 = vmatpush3.bf16.msra.mxu0 %v3578_v0  ;;  %3452 = vmatpush3.bf16.msra.mxu1 %v3578_v0  ;;  %v3586_v4 = vld [vmem:[%s4438_s2] sm:$0xff]   ;;  %v3583_v7 = vld [vmem:[#allocation4 + $0x10] sm:$0xff]   ;;  %v3584_v8 = vld [vmem:[#allocation4 + $0x8] sm:$0xff]  }
  0x35   :  { %3267 = vmatprep.subr.bf16.mxu0 %v3579_v1  ;;  %3445 = vmatprep.subr.bf16.mxu1 %v3579_v1  ;;  %v3587_v5 = vld [vmem:[%s4438_s2 + $0x40] sm:$0xff]   ;;  %v3588_v10 = vld [vmem:[%s4438_s2 + $0x8] sm:$0xff]   ;;  %v3590_v12 = vld [vmem:[%s4438_s2 + $0x10] sm:$0xff]  }
  0x36   :  { %3281 = vmatprep.mubr.bf16.mxu0 %v3586_v4  ;;  %3297 = vmatprep.mubr.bf16.mxu1 %v3587_v5  ;;  %v3585_v9 = vld [vmem:[#allocation4] sm:$0xff]   ;;  %v3589_v11 = vld [vmem:[%s4438_s2 + $0x48] sm:$0xff]   ;;  %v3591_v13 = vld [vmem:[%s4438_s2 + $0x50] sm:$0xff]  }
  0x37   :  { %v3592_v14 = vld [vmem:[%s4438_s2 + $0x18] sm:$0xff]   ;;  %v3594_v16 = vld [vmem:[%s4438_s2 + $0x20] sm:$0xff]   ;;  %v3596_v18 = vld [vmem:[%s4438_s2 + $0x28] sm:$0xff]  }
  0x38   :  { %3268 = vmatpush3.bf16.msra.mxu0 %v3579_v1  ;;  %3453 = vmatpush3.bf16.msra.mxu1 %v3579_v1  ;;  %v3593_v15 = vld [vmem:[%s4438_s2 + $0x58] sm:$0xff]   ;;  %v3595_v17 = vld [vmem:[%s4438_s2 + $0x60] sm:$0xff]   ;;  %v3597_v19 = vld [vmem:[%s4438_s2 + $0x68] sm:$0xff]  }
  0x39   :  { %3269 = vmatprep.subr.bf16.mxu0 %v3580_v2  ;;  %3446 = vmatprep.subr.bf16.mxu1 %v3580_v2  ;;  %v3598_v20 = vld [vmem:[%s4438_s2 + $0x30] sm:$0xff]   ;;  %v3600_v22 = vld [vmem:[%s4438_s2 + $0x38] sm:$0xff]  }
  0x3a   :  { %v3599_v21 = vld [vmem:[%s4438_s2 + $0x70] sm:$0xff]   ;;  %v3601_v23 = vld [vmem:[%s4438_s2 + $0x78] sm:$0xff]   ;;  %s3977_s2 = smov 0  }
  0x3c   :  { %3270 = vmatpush3.bf16.msra.mxu0 %v3580_v2  ;;  %3454 = vmatpush3.bf16.msra.mxu1 %v3580_v2 }
  0x3d   :  { %3271 = vmatprep.subr.bf16.mxu0 %v3581_v3  ;;  %3447 = vmatprep.subr.bf16.mxu1 %v3581_v3 }
  0x40   :  { %3272 = vmatpush3.bf16.msra.mxu0 %v3581_v3  ;;  %3455 = vmatpush3.bf16.msra.mxu1 %v3581_v3 }
  0x41   :  { %3273 = vmatprep.subr.bf16.mxu0 %v3582_v6  ;;  %3448 = vmatprep.subr.bf16.mxu1 %v3582_v6 }
  0x44   :  { %3274 = vmatpush3.bf16.msra.mxu0 %v3582_v6  ;;  %3456 = vmatpush3.bf16.msra.mxu1 %v3582_v6 }
  0x45   :  { %3275 = vmatprep.subr.bf16.mxu0 %v3583_v7  ;;  %3449 = vmatprep.subr.bf16.mxu1 %v3583_v7 }
  0x48   :  { %3276 = vmatpush3.bf16.msra.mxu0 %v3583_v7  ;;  %3457 = vmatpush3.bf16.msra.mxu1 %v3583_v7 }
  0x49   :  { %3277 = vmatprep.subr.bf16.mxu0 %v3584_v8  ;;  %3450 = vmatprep.subr.bf16.mxu1 %v3584_v8 }
  0x4c   :  { %3278 = vmatpush3.bf16.msra.mxu0 %v3584_v8  ;;  %3458 = vmatpush3.bf16.msra.mxu1 %v3584_v8 }
  0x4d   :  { %3279 = vmatprep.subr.bf16.mxu0 %v3585_v9  ;;  %3451 = vmatprep.subr.bf16.mxu1 %v3585_v9 }
  0x50   :  { %3280 = vmatpush3.bf16.msra.mxu0 %v3585_v9  ;;  %3459 = vmatpush3.bf16.msra.mxu1 %v3585_v9 }
  0x53   :  { %3282 = vmatmul.mubr.bf16.vlgmr.msra.gmra.mxu0 %v3588_v10  ;;  %3298 = vmatmul.mubr.bf16.vlgmr.msra.gmra.mxu1 %v3589_v11 }
  0x54   :  { %3285 = vmatprep.mubr.bf16.mxu0 %v3590_v12  ;;  %3301 = vmatprep.mubr.bf16.mxu1 %v3591_v13 }
  0x5b   :  { %3286 = vmatmul.mubr.bf16.gmra.mxu0 %v3592_v14  ;;  %3302 = vmatmul.mubr.bf16.gmra.mxu1 %v3593_v15 }
  0x5c   :  { %3289 = vmatprep.mubr.bf16.mxu0 %v3594_v16  ;;  %3305 = vmatprep.mubr.bf16.mxu1 %v3595_v17 }
  0x63   :  { %3290 = vmatmul.mubr.bf16.gmra.mxu0 %v3596_v18  ;;  %3306 = vmatmul.mubr.bf16.gmra.mxu1 %v3597_v19 }
  0x64   :  { %3293 = vmatprep.mubr.bf16.mxu0 %v3598_v20  ;;  %3309 = vmatprep.mubr.bf16.mxu1 %v3599_v21 }
  0x6b   :  { %3294 = vmatmul.mubr.bf16.gmra.mxu0 %v3600_v22  ;;  %3310 = vmatmul.mubr.bf16.gmra.mxu1 %v3601_v23 }
 0x113   :  { %v3283_v24 = vpop.f32.mrf.mxu0  ;;  %v3299_v25 = vpop.f32.mrf.mxu1 }
 0x115   :  { %v324_v26 = vpop.f32.mrf.mxu0  ;;  %v388_v27 = vpop.f32.mrf.mxu1 }
 0x117   :  { %v3284_v28 = vpop.f32.mrf.mxu0  ;;  %v3300_v29 = vpop.f32.mrf.mxu1 }
 0x118   :  { %v3945_v30 = vpack.c.bf16 %v3284_v28, %v3283_v24  ;;  %v3947_v31 = vpack.c.bf16 %v3300_v29, %v3299_v25 }
 0x119   :  { %v327_v32 = vpop.f32.mrf.mxu0  ;;  %v391_v33 = vpop.f32.mrf.mxu1 }
 0x11a   :  { %v3949_v34 = vpack.c.bf16 %v327_v32, %v324_v26  ;;  %v3951_v35 = vpack.c.bf16 %v391_v33, %v388_v27 }
 0x11b   :  { %v3287_v36 = vpop.f32.mrf.mxu0  ;;  %v3303_v37 = vpop.f32.mrf.mxu1 }
 0x11d   :  { %v340_v38 = vpop.f32.mrf.mxu0  ;;  %v404_v39 = vpop.f32.mrf.mxu1 }
 0x11f   :  { %v3288_v40 = vpop.f32.mrf.mxu0  ;;  %v3304_v41 = vpop.f32.mrf.mxu1 }
 0x120   :  { %v3953_v42 = vpack.c.bf16 %v3288_v40, %v3287_v36  ;;  %v3955_v43 = vpack.c.bf16 %v3304_v41, %v3303_v37 }
 0x121   :  { %v343_v44 = vpop.f32.mrf.mxu0  ;;  %v407_v45 = vpop.f32.mrf.mxu1 }
 0x122   :  { %v3957_v46 = vpack.c.bf16 %v343_v44, %v340_v38  ;;  %v3959_v47 = vpack.c.bf16 %v407_v45, %v404_v39 }
 0x123   :  { %v3291_v48 = vpop.f32.mrf.mxu0  ;;  %v3307_v49 = vpop.f32.mrf.mxu1 }
 0x125   :  { %v356_v50 = vpop.f32.mrf.mxu0  ;;  %v420_v51 = vpop.f32.mrf.mxu1 }
 0x127   :  { %v3292_v52 = vpop.f32.mrf.mxu0  ;;  %v3308_v53 = vpop.f32.mrf.mxu1 }
 0x128   :  { %v3961_v54 = vpack.c.bf16 %v3292_v52, %v3291_v48  ;;  %v3963_v55 = vpack.c.bf16 %v3308_v53, %v3307_v49 }
 0x129   :  { %v359_v56 = vpop.f32.mrf.mxu0  ;;  %v423_v57 = vpop.f32.mrf.mxu1 }
 0x12a   :  { %v3965_v58 = vpack.c.bf16 %v359_v56, %v356_v50  ;;  %v3967_v59 = vpack.c.bf16 %v423_v57, %v420_v51 }
 0x12b   :  { %v3295_v60 = vpop.f32.mrf.mxu0  ;;  %v3311_v61 = vpop.f32.mrf.mxu1 }
 0x12d   :  { %v372_v62 = vpop.f32.mrf.mxu0  ;;  %v436_v63 = vpop.f32.mrf.mxu1 }
 0x12f   :  { %v3296_v0 = vpop.f32.mrf.mxu0  ;;  %v3312_v1 = vpop.f32.mrf.mxu1 }
 0x130   :  { %v3969_v2 = vpack.c.bf16 %v3296_v0, %v3295_v60  ;;  %v3971_v3 = vpack.c.bf16 %v3312_v1, %v3311_v61 }
 0x131   :  { %v375_v4 = vpop.f32.mrf.mxu0  ;;  %v439_v5 = vpop.f32.mrf.mxu1 }
 0x132   :  { %v3973_v6 = vpack.c.bf16 %v375_v4, %v372_v62  ;;  %v3975_v7 = vpack.c.bf16 %v439_v5, %v436_v63 }
 0x133 LB: > { %2986 = vmatprep.subr.bf16.mxu0 %v3971_v3  ;;  %3460 = vmatprep.subr.bf16.mxu1 %v3971_v3  ;;  %s3989_s15 = sshll.u32 %s3796_s2, 7  ;;  %v3814_v8 = vmov 0   ;;  %s472_s2 = sadd.s32 1, %s3796_s2   ;;  %s3796_s2 = sphi %s3977_s2, %s472_s2  }
 0x134   : > { %2987 = vmatpush3.bf16.msra.mxu0 %v3969_v2  ;;  %3468 = vmatpush3.bf16.msra.mxu1 %v3969_v2  ;;  %s474_s16 = sshra.s32 %s3989_s15, 5  ;;  %s3996_s19 = scalar_lea.vmem %s4437_s1, %s3989_s15 }
 0x135   : > { %2988 = vmatprep.subr.bf16.mxu0 %v3975_v7  ;;  %3461 = vmatprep.subr.bf16.mxu1 %v3975_v7  ;;  %s2770_s5 = sshll.u32 %s474_s16, 4  ;;  %v603_v9 = vld [vmem:[%s3996_s19 + $0x10] sm:$0xff]  ;;  %v601_v10 = vld [vmem:[%s3996_s19] sm:$0xff]  ;;  %v604_v15 = vld [vmem:[%s3996_s19 + $0x18] sm:$0xff]  ;;  %s816_s24 = sshra.s32 %s3989_s15, 3 }
 0x136   : > { %3603 = vset.pattern.permute.xlu1 %v3814_v8  ;;  %3602 = vset.pattern.permute.xlu0 %v3814_v8  ;;  %s4005_s3 = scalar_lea.vmem %s4436_s0, %s2770_s5  ;;  %v602_v16 = vld [vmem:[%s3996_s19 + $0x8] sm:$0xff]  ;;  %v605_v18 = vld [vmem:[%s3996_s19 + $0x20] sm:$0xff]  ;;  %v608_v19 = vld [vmem:[%s3996_s19 + $0x38] sm:$0xff]  ;;  %s2660_s7 = sshll.u32 %s816_s24, 2 }
 0x137   : > { %v480_v11 = vld [vmem:[%s4005_s3 + $0x8] sm:$0xff]  ;;  %629 = vperm.xlu1 %3603, %v603_v9   ;;  %619 = vperm.xlu0 %3602, %v601_v10   ;;  %v607_v20 = vld [vmem:[%s3996_s19 + $0x30] sm:$0xff]  ;;  %v609_v22 = vld [vmem:[%s3996_s19 + $0x40] sm:$0xff]  ;;  %s4071_s10 = scalar_lea.vmem [#allocation2], %s2660_s7  ;;  %p469_p6 = scmp.ge.s32.totalorder %s472_s2, 2  }
 0x138   : > { %2989 = vmatpush3.bf16.msra.mxu0 %v3973_v6  ;;  %3469 = vmatpush3.bf16.msra.mxu1 %v3973_v6  ;;  %v484_v12 = vld [vmem:[%s4005_s3 + $0x28] sm:$0xff]  ;;  %v488_v13 = vunpack.c.l.s8.bf16 %v480_v11  ;;  %v479_v23 = vld [vmem:[%s4005_s3] sm:$0xff]  ;;  %v612_v25 = vld [vmem:[%s3996_s19 + $0x58] sm:$0xff]  ;;  %v490_v29 = vunpack.c.h.s8.bf16 %v480_v11 }
 0x139   : > { %2990 = vmatprep.subr.bf16.mxu0 %v3963_v55  ;;  %3462 = vmatprep.subr.bf16.mxu1 %v3963_v55  ;;  %v496_v14 = vunpack.c.l.s8.bf16 %v484_v12  ;;  %v606_v17 = vld [vmem:[%s3996_s19 + $0x28] sm:$0xff]  ;;  %v483_v24 = vld [vmem:[%s4005_s3 + $0x20] sm:$0xff]  ;;  %v611_v26 = vld [vmem:[%s3996_s19 + $0x50] sm:$0xff]  ;;  %v487_v27 = vunpack.c.l.s8.bf16 %v479_v23  ;;  %v498_v32 = vunpack.c.h.s8.bf16 %v484_v12  ;;  %v489_v41 = vunpack.c.h.s8.bf16 %v479_v23 }
 0x13a   : > { %535 = vmatprep.mubr.bf16.mxu0 %v488_v13  ;;  %v610_v21 = vld [vmem:[%s3996_s19 + $0x48] sm:$0xff]  ;;  %v495_v28 = vunpack.c.l.s8.bf16 %v483_v24  ;;  %v613_v36 = vld [vmem:[%s3996_s19 + $0x60] sm:$0xff]  ;;  %v482_v37 = vld [vmem:[%s4005_s3 + $0x18] sm:$0xff]  ;;  %v497_v44 = vunpack.c.h.s8.bf16 %v483_v24 }
 0x13b   : > { %567 = vmatprep.mubr.bf16.mxu1 %v496_v14  ;;  %634 = vperm.xlu1 %3603, %v604_v15   ;;  %v614_v33 = vld [vmem:[%s3996_s19 + $0x68] sm:$0xff]  ;;  %v486_v38 = vld [vmem:[%s4005_s3 + $0x38] sm:$0xff]  ;;  %v615_v40 = vld [vmem:[%s3996_s19 + $0x70] sm:$0xff]  ;;  %v492_v45 = vunpack.c.l.s8.bf16 %v482_v37  ;;  %v494_v53 = vunpack.c.h.s8.bf16 %v482_v37 }
 0x13c   : > { %2991 = vmatpush3.bf16.msra.mxu0 %v3961_v54  ;;  %3470 = vmatpush3.bf16.msra.mxu1 %v3961_v54  ;;  %v616_v39 = vld [vmem:[%s3996_s19 + $0x78] sm:$0xff]  ;;  %v500_v48 = vunpack.c.l.s8.bf16 %v486_v38  ;;  %v481_v49 = vld [vmem:[%s4005_s3 + $0x10] sm:$0xff]  ;;  %v502_v56 = vunpack.c.h.s8.bf16 %v486_v38 }
 0x13d   : > { %2992 = vmatprep.subr.bf16.mxu0 %v3967_v59  ;;  %3463 = vmatprep.subr.bf16.mxu1 %v3967_v59  ;;  %v485_v50 = vld [vmem:[%s4005_s3 + $0x30] sm:$0xff]  ;;  %v491_v51 = vunpack.c.l.s8.bf16 %v481_v49  ;;  %v493_v57 = vunpack.c.h.s8.bf16 %v481_v49 }
 0x13e   : > { %624 = vperm.xlu0 %3602, %v602_v16   ;;  %v499_v52 = vunpack.c.l.s8.bf16 %v485_v50  ;;  %v501_v60 = vunpack.c.h.s8.bf16 %v485_v50 }
 0x13f   : > { %644 = vperm.xlu1 %3603, %v606_v17  }
 0x140   : > { %2993 = vmatpush3.bf16.msra.mxu0 %v3965_v58  ;;  %3471 = vmatpush3.bf16.msra.mxu1 %v3965_v58 }
 0x141   : > { %2994 = vmatprep.subr.bf16.mxu0 %v3955_v43  ;;  %3464 = vmatprep.subr.bf16.mxu1 %v3955_v43 }
 0x142   : > { %639 = vperm.xlu0 %3602, %v605_v18  }
 0x143   : > { %654 = vperm.xlu1 %3603, %v608_v19  }
 0x144   : > { %2995 = vmatpush3.bf16.msra.mxu0 %v3953_v42  ;;  %3472 = vmatpush3.bf16.msra.mxu1 %v3953_v42 }
 0x145   : > { %2996 = vmatprep.subr.bf16.mxu0 %v3959_v47  ;;  %3465 = vmatprep.subr.bf16.mxu1 %v3959_v47 }
 0x146   : > { %649 = vperm.xlu0 %3602, %v607_v20   ;;  %v4064_v20 = vld [vmem:[%s4440_s4] ss:$0 sm:$0xff]  ;;  %s4132_s4 = smov (%p469_p6), 0  }
 0x147   : > { %664 = vperm.xlu1 %3603, %v610_v21  }
 0x148   : > { %2997 = vmatpush3.bf16.msra.mxu0 %v3957_v46  ;;  %3473 = vmatpush3.bf16.msra.mxu1 %v3957_v46 }
 0x149   : > { %2998 = vmatprep.subr.bf16.mxu0 %v3947_v31  ;;  %3466 = vmatprep.subr.bf16.mxu1 %v3947_v31  ;;  %v3609_v31 = vld [vmem:[#allocation7 + $0x10] sm:$0xff] (%p469_p6)  }
 0x14a   : > { %659 = vperm.xlu0 %3602, %v609_v22  }
 0x14b   : > { %674 = vperm.xlu1 %3603, %v612_v25  }
 0x14c   : > { %2999 = vmatpush3.bf16.msra.mxu0 %v3945_v30  ;;  %3474 = vmatpush3.bf16.msra.mxu1 %v3945_v30  ;;  %v3608_v30 = vld [vmem:[#allocation7 + $0x18] sm:$0xff] (%p469_p6)  }
 0x14d   : > { %3000 = vmatprep.subr.bf16.mxu0 %v3951_v35  ;;  %3467 = vmatprep.subr.bf16.mxu1 %v3951_v35  ;;  %v3611_v35 = vld [vmem:[#allocation7] sm:$0xff] (%p469_p6)  }
 0x14e   : > { %669 = vperm.xlu0 %3602, %v611_v26  }
 0x14f   : > { %684 = vperm.xlu1 %3603, %v614_v33  }
 0x150   : > { %3001 = vmatpush3.bf16.msra.mxu0 %v3949_v34  ;;  %3475 = vmatpush3.bf16.msra.mxu1 %v3949_v34  ;;  %v3610_v34 = vld [vmem:[#allocation7 + $0x8] sm:$0xff] (%p469_p6)  }
 0x152   : > { %679 = vperm.xlu0 %3602, %v613_v36  }
 0x153   : > { %536 = vmatmul.mubr.bf16.vlgmr.msra.gmra.mxu0 %v487_v27  ;;  %568 = vmatmul.mubr.bf16.vlgmr.msra.gmra.mxu1 %v495_v28 }
 0x154   : > { %543 = vmatprep.mubr.bf16.mxu0 %v490_v29  ;;  %575 = vmatprep.mubr.bf16.mxu1 %v498_v32 }
 0x155   : > { %694 = vperm.xlu1 %3603, %v616_v39  }
 0x156   : > { %689 = vperm.xlu0 %3602, %v615_v40  }
 0x15b   : > { %544 = vmatmul.mubr.bf16.gmra.mxu0 %v489_v41  ;;  %576 = vmatmul.mubr.bf16.gmra.mxu1 %v497_v44 }
 0x15c   : > { %551 = vmatprep.mubr.bf16.mxu0 %v492_v45  ;;  %583 = vmatprep.mubr.bf16.mxu1 %v500_v48 }
 0x163   : > { %552 = vmatmul.mubr.bf16.gmra.mxu0 %v491_v51  ;;  %584 = vmatmul.mubr.bf16.gmra.mxu1 %v499_v52 }
 0x164   : > { %559 = vmatprep.mubr.bf16.mxu0 %v494_v53  ;;  %591 = vmatprep.mubr.bf16.mxu1 %v502_v56 }
 0x16b   : > { %560 = vmatmul.mubr.bf16.gmra.mxu0 %v493_v57  ;;  %592 = vmatmul.mubr.bf16.gmra.mxu1 %v501_v60 }
 0x1b2   : > { %v620_v61 = vpop.permute.xlu0 %619  ;;  %v630_v62 = vpop.permute.xlu1 %629 }
 0x1b6   : > { %v635_v0 = vpop.permute.xlu1 %634 }
 0x1b9   : > { %v625_v63 = vpop.permute.xlu0 %624 }
 0x1ba   : > { %v4055_v4 = vpop.permute.xlu1 %644 }
 0x1bd   : > { %v4053_v1 = vpop.permute.xlu0 %639 }
 0x1be   : > { %v4059_v10 = vpop.permute.xlu1 %654 }
 0x1c1   : > { %v4057_v5 = vpop.permute.xlu0 %649 }
 0x1c2   : > { %v665_v23 = vpop.permute.xlu1 %664 }
 0x1c5   : > { %v660_v13 = vpop.permute.xlu0 %659 }
 0x1c9   : > { %v670_v48 = vpop.permute.xlu0 %669 }
 0x213   : > { %v3002_v8 = vpop.f32.mrf.mxu0  ;;  %v3026_v9 = vpop.f32.mrf.mxu1 }
 0x215   : > { %v3003_v11 = vpop.f32.mrf.mxu0  ;;  %v3027_v12 = vpop.f32.mrf.mxu1 }
 0x216   : > { %v3004_v14 = vadd.f32 %v3003_v11, %v3002_v8  ;;  %v3028_v15 = vadd.f32 %v3027_v12, %v3026_v9 }
 0x217   : > { %v3005_v16 = vpop.f32.mrf.mxu0  ;;  %v3029_v17 = vpop.f32.mrf.mxu1 }
 0x218   : > { %v697_v18 = vmul.f32 %v3004_v14, %v620_v61  ;;  %v705_v19 = vmul.f32 %v3028_v15, %v660_v13  ;;  %v675_v13 = vpop.permute.xlu1 %674 }
 0x219   : > { %v3006_v21 = vpop.f32.mrf.mxu0  ;;  %v3030_v22 = vpop.f32.mrf.mxu1 }
 0x21a   : > { %v3007_v24 = vadd.f32 %v3006_v21, %v3005_v16  ;;  %v3031_v25 = vadd.f32 %v3030_v22, %v3029_v17  ;;  %v720_v28 = vadd.f32 %v4064_v20, %v697_v18  ;;  %v728_v29 = vadd.f32 %v4064_v20, %v705_v19  ;;  %v680_v19 = vpop.permute.xlu0 %679 }
 0x21b   : > { %v3008_v26 = vpop.f32.mrf.mxu0  ;;  %v3032_v27 = vpop.f32.mrf.mxu1 }
 0x21c   : > { %v698_v32 = vmul.f32 %v3007_v24, %v625_v63  ;;  %v706_v33 = vmul.f32 %v3031_v25, %v665_v23  ;;  %v736_v49 = vmax.f32 %v720_v28, 0.0  ;;  %v744_v50 = vmax.f32 %v728_v29, 0.0 }
 0x21d   : > { %v3009_v36 = vpop.f32.mrf.mxu0  ;;  %v3033_v37 = vpop.f32.mrf.mxu1 }
 0x21e   : > { %v721_v38 = vadd.f32 %v4064_v20, %v698_v32  ;;  %v729_v39 = vadd.f32 %v4064_v20, %v706_v33  ;;  %v3010_v40 = vadd.f32 %v3009_v36, %v3008_v26  ;;  %v3034_v41 = vadd.f32 %v3033_v37, %v3032_v27 }
 0x21f   : > { %v3011_v44 = vpop.f32.mrf.mxu0  ;;  %v3035_v45 = vpop.f32.mrf.mxu1 }
 0x220   : > { %v737_v51 = vmax.f32 %v721_v38, 0.0  ;;  %v745_v52 = vmax.f32 %v729_v39, 0.0  ;;  %v699_v53 = vmul.f32 %v3010_v40, %v630_v62  ;;  %v707_v56 = vmul.f32 %v3034_v41, %v670_v48  ;;  %v685_v38 = vpop.permute.xlu1 %684 }
 0x221   : > { %v3012_v57 = vpop.f32.mrf.mxu0  ;;  %v3036_v60 = vpop.f32.mrf.mxu1 }
 0x222   : > { %v2824_v61 = vpack.c.bf16 %v737_v51, %v736_v49  ;;  %v2844_v63 = vpack.c.bf16 %v745_v52, %v744_v50  ;;  %v3013_v8 = vadd.f32 %v3012_v57, %v3011_v44  ;;  %v3037_v9 = vadd.f32 %v3036_v60, %v3035_v45 }
 0x223   : > { %v3014_v11 = vpop.f32.mrf.mxu0  ;;  %v3038_v12 = vpop.f32.mrf.mxu1  ;;  %v722_v14 = vadd.f32 %v4064_v20, %v699_v53  ;;  %v730_v62 = vadd.f32 %v4064_v20, %v707_v56 }
 0x224   : > { %2825 = vst [vmem:[%s4071_s10] sm:$0xff] %v2824_v61   ;;  %2944 = vst [vmem:[%s4071_s10 + $0x20] sm:$0xff] %v2844_v63   ;;  %v700_v15 = vmul.f32 %v3013_v8, %v635_v0  ;;  %v708_v16 = vmul.f32 %v3037_v9, %v675_v13  ;;  %v690_v9 = vpop.permute.xlu0 %689 }
 0x225   : > { %v3015_v17 = vpop.f32.mrf.mxu0  ;;  %v3039_v18 = vpop.f32.mrf.mxu1  ;;  %v738_v29 = vmax.f32 %v722_v14, 0.0  ;;  %v746_v32 = vmax.f32 %v730_v62, 0.0 }
 0x226   : > { %v3016_v21 = vadd.f32 %v3015_v17, %v3014_v11  ;;  %v3040_v22 = vadd.f32 %v3039_v18, %v3038_v12  ;;  %v723_v23 = vadd.f32 %v4064_v20, %v700_v15  ;;  %v731_v24 = vadd.f32 %v4064_v20, %v708_v16 }
 0x227   : > { %v3017_v25 = vpop.f32.mrf.mxu0  ;;  %v3041_v26 = vpop.f32.mrf.mxu1 }
 0x228   : > { %v701_v27 = vmul.f32 %v3016_v21, %v4053_v1  ;;  %v709_v28 = vmul.f32 %v3040_v22, %v680_v19  ;;  %v739_v33 = vmax.f32 %v723_v23, 0.0  ;;  %v747_v0 = vmax.f32 %v731_v24, 0.0  ;;  %v695_v22 = vpop.permute.xlu1 %694 }
 0x229   : > { %v3018_v36 = vpop.f32.mrf.mxu0  ;;  %v3042_v37 = vpop.f32.mrf.mxu1 }
 0x22a   : > { %v3019_v39 = vadd.f32 %v3018_v36, %v3017_v25  ;;  %v3043_v40 = vadd.f32 %v3042_v37, %v3041_v26  ;;  %v2829_v41 = vpack.c.bf16 %v739_v33, %v738_v29  ;;  %v2849_v44 = vpack.c.bf16 %v747_v0, %v746_v32  ;;  %v3605_v37 = vld [vmem:[#allocation7 + $0x30] sm:$0xff] (%p469_p6)  }
 0x22b   : > { %v3020_v45 = vpop.f32.mrf.mxu0  ;;  %v3044_v48 = vpop.f32.mrf.mxu1  ;;  %v724_v49 = vadd.f32 %v4064_v20, %v701_v27  ;;  %v732_v1 = vadd.f32 %v4064_v20, %v709_v28 }
 0x22c   : > { %v702_v50 = vmul.f32 %v3019_v39, %v4055_v4  ;;  %v710_v51 = vmul.f32 %v3043_v40, %v685_v38  ;;  %2941 = vst [vmem:[%s4071_s10 + $0x8] sm:$0xff] %v2829_v41   ;;  %2945 = vst [vmem:[%s4071_s10 + $0x28] sm:$0xff] %v2849_v44   ;;  %v3607_v38 = vld [vmem:[#allocation7 + $0x20] sm:$0xff] (%p469_p6)  }
 0x22d   : > { %v3021_v52 = vpop.f32.mrf.mxu0  ;;  %v3045_v53 = vpop.f32.mrf.mxu1  ;;  %v740_v11 = vmax.f32 %v724_v49, 0.0  ;;  %v748_v12 = vmax.f32 %v732_v1, 0.0 }
 0x22e   : > { %v725_v56 = vadd.f32 %v4064_v20, %v702_v50  ;;  %v733_v57 = vadd.f32 %v4064_v20, %v710_v51  ;;  %v3022_v60 = vadd.f32 %v3021_v52, %v3020_v45  ;;  %v3046_v61 = vadd.f32 %v3045_v53, %v3044_v48 }
 0x22f   : > { %v3023_v63 = vpop.f32.mrf.mxu0  ;;  %v3047_v8 = vpop.f32.mrf.mxu1 }
 0x230   : > { %v741_v13 = vmax.f32 %v725_v56, 0.0  ;;  %v749_v4 = vmax.f32 %v733_v57, 0.0  ;;  %v703_v14 = vmul.f32 %v3022_v60, %v4057_v5  ;;  %v711_v62 = vmul.f32 %v3046_v61, %v690_v9 }
 0x231   : > { %v3024_v15 = vpop.f32.mrf.mxu0  ;;  %v3048_v16 = vpop.f32.mrf.mxu1 }
 0x232   : > { %v2834_v17 = vpack.c.bf16 %v741_v13, %v740_v11  ;;  %v2854_v18 = vpack.c.bf16 %v749_v4, %v748_v12  ;;  %v3025_v19 = vadd.f32 %v3024_v15, %v3023_v63  ;;  %v3049_v21 = vadd.f32 %v3048_v16, %v3047_v8 }
 0x233   : > { %v726_v23 = vadd.f32 %v4064_v20, %v703_v14  ;;  %v734_v24 = vadd.f32 %v4064_v20, %v711_v62 }
 0x234   : > { %2942 = vst [vmem:[%s4071_s10 + $0x10] sm:$0xff] %v2834_v17   ;;  %2946 = vst [vmem:[%s4071_s10 + $0x30] sm:$0xff] %v2854_v18   ;;  %v704_v25 = vmul.f32 %v3025_v19, %v4059_v10  ;;  %v712_v26 = vmul.f32 %v3049_v21, %v695_v22  ;;  %v3604_v10 = vld [vmem:[#allocation7 + $0x38] sm:$0xff] (%p469_p6)  }
 0x235   : > { %v742_v28 = vmax.f32 %v726_v23, 0.0  ;;  %v750_v29 = vmax.f32 %v734_v24, 0.0  ;;  %3313 = vmatprep.subr.bf16.mxu0 (%p469_p6), %v3604_v10  ;;  %3476 = vmatprep.subr.bf16.mxu1 (%p469_p6), %v3604_v10 }
 0x236   : > { %v727_v5 = vadd.f32 %v4064_v20, %v704_v25  ;;  %v735_v27 = vadd.f32 %v4064_v20, %v712_v26  ;;  %3314 = vmatpush3.bf16.msra.mxu0 (%p469_p6), %v3604_v10  ;;  %3484 = vmatpush3.bf16.msra.mxu1 (%p469_p6), %v3604_v10  ;;  %v3606_v20 = vld [vmem:[#allocation7 + $0x28] sm:$0xff] (%p469_p6)  }
 0x237   :  { %3315 = vmatprep.subr.bf16.mxu0 (%p469_p6), %v3605_v37  ;;  %3477 = vmatprep.subr.bf16.mxu1 (%p469_p6), %v3605_v37 }
 0x238   : > { %v743_v32 = vmax.f32 %v727_v5, 0.0  ;;  %v751_v33 = vmax.f32 %v735_v27, 0.0  ;;  %471 = sbr.rel (!%p469_p6) target bundleno = 307 (0x133), region = 114 }
 0x23a   : > { %v2839_v0 = vpack.c.bf16 %v743_v32, %v742_v28  ;;  %v2859_v36 = vpack.c.bf16 %v751_v33, %v750_v29  ;;  %3316 = vmatpush3.bf16.msra.mxu0 (%p469_p6), %v3605_v37  ;;  %3485 = vmatpush3.bf16.msra.mxu1 (%p469_p6), %v3605_v37 }
 0x23b   :  { %3317 = vmatprep.subr.bf16.mxu0 (%p469_p6), %v3606_v20  ;;  %3478 = vmatprep.subr.bf16.mxu1 (%p469_p6), %v3606_v20 }
 0x23c   : > { %2943 = vst [vmem:[%s4071_s10 + $0x18] sm:$0xff] %v2839_v0   ;;  %2947 = vst [vmem:[%s4071_s10 + $0x38] sm:$0xff] %v2859_v36  }
 0x23e   :  { %3318 = vmatpush3.bf16.msra.mxu0 %v3606_v20  ;;  %3486 = vmatpush3.bf16.msra.mxu1 %v3606_v20 }
 0x23f   :  { %3319 = vmatprep.subr.bf16.mxu0 %v3607_v38  ;;  %3479 = vmatprep.subr.bf16.mxu1 %v3607_v38 }
 0x242   :  { %3320 = vmatpush3.bf16.msra.mxu0 %v3607_v38  ;;  %3487 = vmatpush3.bf16.msra.mxu1 %v3607_v38 }
 0x243   :  { %v3612_v39 = vld [vmem:[#allocation2] sm:$0xff]   ;;  %3321 = vmatprep.subr.bf16.mxu0 %v3608_v30  ;;  %3480 = vmatprep.subr.bf16.mxu1 %v3608_v30  ;;  %v3614_v42 = vld [vmem:[#allocation2 + $0x8] sm:$0xff]   ;;  %v3616_v46 = vld [vmem:[#allocation2 + $0x10] sm:$0xff]  }
 0x244   :  { %v3613_v40 = vld [vmem:[#allocation2 + $0x40] sm:$0xff]   ;;  %3329 = vmatprep.mubr.bf16.mxu0 %v3612_v39  ;;  %v3615_v43 = vld [vmem:[#allocation2 + $0x48] sm:$0xff]   ;;  %v3617_v47 = vld [vmem:[#allocation2 + $0x50] sm:$0xff]  }
 0x245   :  { %3345 = vmatprep.mubr.bf16.mxu1 %v3613_v40  ;;  %v3618_v54 = vld [vmem:[#allocation2 + $0x18] sm:$0xff]   ;;  %v3620_v58 = vld [vmem:[#allocation2 + $0x20] sm:$0xff]   ;;  %v3622_v2 = vld [vmem:[#allocation2 + $0x28] sm:$0xff]  }
 0x246   :  { %3322 = vmatpush3.bf16.msra.mxu0 %v3608_v30  ;;  %3488 = vmatpush3.bf16.msra.mxu1 %v3608_v30  ;;  %v3619_v55 = vld [vmem:[#allocation2 + $0x58] sm:$0xff]   ;;  %v3621_v59 = vld [vmem:[#allocation2 + $0x60] sm:$0xff]   ;;  %v3623_v3 = vld [vmem:[#allocation2 + $0x68] sm:$0xff]  }
 0x247   :  { %3323 = vmatprep.subr.bf16.mxu0 %v3609_v31  ;;  %3481 = vmatprep.subr.bf16.mxu1 %v3609_v31  ;;  %v3624_v6 = vld [vmem:[#allocation2 + $0x30] sm:$0xff]   ;;  %v3626_v41 = vld [vmem:[#allocation2 + $0x38] sm:$0xff]  }
 0x248   :  { %v3625_v7 = vld [vmem:[#allocation2 + $0x70] sm:$0xff]   ;;  %v3627_v44 = vld [vmem:[#allocation2 + $0x78] sm:$0xff]  }
 0x24a   :  { %3324 = vmatpush3.bf16.msra.mxu0 %v3609_v31  ;;  %3489 = vmatpush3.bf16.msra.mxu1 %v3609_v31 }
 0x24b   :  { %3325 = vmatprep.subr.bf16.mxu0 %v3610_v34  ;;  %3482 = vmatprep.subr.bf16.mxu1 %v3610_v34 }
 0x24e   :  { %3326 = vmatpush3.bf16.msra.mxu0 %v3610_v34  ;;  %3490 = vmatpush3.bf16.msra.mxu1 %v3610_v34 }
 0x24f   :  { %3327 = vmatprep.subr.bf16.mxu0 %v3611_v35  ;;  %3483 = vmatprep.subr.bf16.mxu1 %v3611_v35 }
 0x252   :  { %3328 = vmatpush3.bf16.msra.mxu0 %v3611_v35  ;;  %3491 = vmatpush3.bf16.msra.mxu1 %v3611_v35 }
 0x255   :  { %3330 = vmatmul.mubr.bf16.vlgmr.msra.gmra.mxu0 %v3614_v42  ;;  %3346 = vmatmul.mubr.bf16.vlgmr.msra.gmra.mxu1 %v3615_v43 }
 0x256   :  { %3333 = vmatprep.mubr.bf16.mxu0 %v3616_v46  ;;  %3349 = vmatprep.mubr.bf16.mxu1 %v3617_v47 }
 0x25d   :  { %3334 = vmatmul.mubr.bf16.gmra.mxu0 %v3618_v54  ;;  %3350 = vmatmul.mubr.bf16.gmra.mxu1 %v3619_v55 }
 0x25e   :  { %3337 = vmatprep.mubr.bf16.mxu0 %v3620_v58  ;;  %3353 = vmatprep.mubr.bf16.mxu1 %v3621_v59 }
 0x265   :  { %3338 = vmatmul.mubr.bf16.gmra.mxu0 %v3622_v2  ;;  %3354 = vmatmul.mubr.bf16.gmra.mxu1 %v3623_v3 }
 0x266   :  { %3341 = vmatprep.mubr.bf16.mxu0 %v3624_v6  ;;  %3357 = vmatprep.mubr.bf16.mxu1 %v3625_v7 }
 0x26d   :  { %3342 = vmatmul.mubr.bf16.gmra.mxu0 %v3626_v41  ;;  %3358 = vmatmul.mubr.bf16.gmra.mxu1 %v3627_v44 }
 0x315   :  { %v3331_v45 = vpop.f32.mrf.mxu0  ;;  %v3347_v48 = vpop.f32.mrf.mxu1 }
 0x317   :  { %v1062_v49 = vpop.f32.mrf.mxu0  ;;  %v1126_v1 = vpop.f32.mrf.mxu1 }
 0x319   :  { %v3332_v50 = vpop.f32.mrf.mxu0  ;;  %v3348_v51 = vpop.f32.mrf.mxu1 }
 0x31a   :  { %v4100_v52 = vpack.c.bf16 %v3332_v50, %v3331_v45  ;;  %v4102_v53 = vpack.c.bf16 %v3348_v51, %v3347_v48 }
 0x31b   :  { %v1065_v56 = vpop.f32.mrf.mxu0  ;;  %v1129_v57 = vpop.f32.mrf.mxu1 }
 0x31c   :  { %v4104_v60 = vpack.c.bf16 %v1065_v56, %v1062_v49  ;;  %v4106_v61 = vpack.c.bf16 %v1129_v57, %v1126_v1 }
 0x31d   :  { %v3335_v63 = vpop.f32.mrf.mxu0  ;;  %v3351_v8 = vpop.f32.mrf.mxu1 }
 0x31f   :  { %v1078_v9 = vpop.f32.mrf.mxu0  ;;  %v1142_v11 = vpop.f32.mrf.mxu1 }
 0x321   :  { %v3336_v12 = vpop.f32.mrf.mxu0  ;;  %v3352_v13 = vpop.f32.mrf.mxu1 }
 0x322   :  { %v4108_v4 = vpack.c.bf16 %v3336_v12, %v3335_v63  ;;  %v4110_v14 = vpack.c.bf16 %v3352_v13, %v3351_v8 }
 0x323   :  { %v1081_v62 = vpop.f32.mrf.mxu0  ;;  %v1145_v15 = vpop.f32.mrf.mxu1 }
 0x324   :  { %v4112_v16 = vpack.c.bf16 %v1081_v62, %v1078_v9  ;;  %v4114_v17 = vpack.c.bf16 %v1145_v15, %v1142_v11 }
 0x325   :  { %v3339_v18 = vpop.f32.mrf.mxu0  ;;  %v3355_v19 = vpop.f32.mrf.mxu1 }
 0x327   :  { %v1094_v21 = vpop.f32.mrf.mxu0  ;;  %v1158_v22 = vpop.f32.mrf.mxu1 }
 0x329   :  { %v3340_v23 = vpop.f32.mrf.mxu0  ;;  %v3356_v24 = vpop.f32.mrf.mxu1 }
 0x32a   :  { %v4116_v25 = vpack.c.bf16 %v3340_v23, %v3339_v18  ;;  %v4118_v26 = vpack.c.bf16 %v3356_v24, %v3355_v19 }
 0x32b   :  { %v1097_v5 = vpop.f32.mrf.mxu0  ;;  %v1161_v27 = vpop.f32.mrf.mxu1 }
 0x32c   :  { %v4120_v28 = vpack.c.bf16 %v1097_v5, %v1094_v21  ;;  %v4122_v29 = vpack.c.bf16 %v1161_v27, %v1158_v22 }
 0x32d   :  { %v3343_v32 = vpop.f32.mrf.mxu0  ;;  %v3359_v33 = vpop.f32.mrf.mxu1 }
 0x32f   :  { %v1110_v0 = vpop.f32.mrf.mxu0  ;;  %v1174_v36 = vpop.f32.mrf.mxu1 }
 0x331   :  { %v3344_v10 = vpop.f32.mrf.mxu0  ;;  %v3360_v37 = vpop.f32.mrf.mxu1 }
 0x332   :  { %v4124_v20 = vpack.c.bf16 %v3344_v10, %v3343_v32  ;;  %v4126_v38 = vpack.c.bf16 %v3360_v37, %v3359_v33 }
 0x333   :  { %v1113_v39 = vpop.f32.mrf.mxu0  ;;  %v1177_v40 = vpop.f32.mrf.mxu1 }
 0x334   :  { %v4128_v30 = vpack.c.bf16 %v1113_v39, %v1110_v0  ;;  %v4130_v31 = vpack.c.bf16 %v1177_v40, %v1174_v36 }
 0x335 LB: > { %3074 = vmatprep.subr.bf16.mxu0 %v4126_v38  ;;  %3492 = vmatprep.subr.bf16.mxu1 %v4126_v38  ;;  %s4144_s25 = sshll.u32 %s3800_s4, 7  ;;  %v3815_v34 = vmov 0   ;;  %s1210_s4 = sadd.s32 1, %s3800_s4   ;;  %s3800_s4 = sphi %s4132_s4, %s1210_s4  }
 0x336   : > { %3075 = vmatpush3.bf16.msra.mxu0 %v4124_v20  ;;  %3500 = vmatpush3.bf16.msra.mxu1 %v4124_v20  ;;  %s1212_s26 = sshra.s32 %s4144_s25, 5  ;;  %s4151_s29 = scalar_lea.vmem %s4437_s1, %s4144_s25 }
 0x337   : > { %3076 = vmatprep.subr.bf16.mxu0 %v4130_v31  ;;  %3493 = vmatprep.subr.bf16.mxu1 %v4130_v31  ;;  %s2787_s30 = sshll.u32 %s1212_s26, 4  ;;  %v1341_v35 = vld [vmem:[%s4151_s29 + $0x10] sm:$0xff]  ;;  %v1339_v42 = vld [vmem:[%s4151_s29] sm:$0xff]  ;;  %v1342_v55 = vld [vmem:[%s4151_s29 + $0x18] sm:$0xff]  ;;  %s1554_s17 = sshra.s32 %s4144_s25, 3 }
 0x338   : > { %3629 = vset.pattern.permute.xlu1 %v3815_v34  ;;  %3628 = vset.pattern.permute.xlu0 %v3815_v34  ;;  %s4160_s2 = scalar_lea.vmem %s4436_s0, %s2787_s30  ;;  %v1340_v58 = vld [vmem:[%s4151_s29 + $0x8] sm:$0xff]  ;;  %v1343_v2 = vld [vmem:[%s4151_s29 + $0x20] sm:$0xff]  ;;  %v1346_v3 = vld [vmem:[%s4151_s29 + $0x38] sm:$0xff]  ;;  %s2705_s18 = sshll.u32 %s1554_s17, 2 }
 0x339   : > { %v1218_v43 = vld [vmem:[%s4160_s2 + $0x8] sm:$0xff]  ;;  %1367 = vperm.xlu1 %3629, %v1341_v35   ;;  %1357 = vperm.xlu0 %3628, %v1339_v42   ;;  %v1345_v6 = vld [vmem:[%s4151_s29 + $0x30] sm:$0xff]  ;;  %v1347_v41 = vld [vmem:[%s4151_s29 + $0x40] sm:$0xff]  ;;  %s4226_s19 = scalar_lea.vmem [#allocation3], %s2705_s18  ;;  %p1207_p7 = scmp.ge.s32.totalorder %s1210_s4, 2  }
 0x33a   : > { %3077 = vmatpush3.bf16.msra.mxu0 %v4128_v30  ;;  %3501 = vmatpush3.bf16.msra.mxu1 %v4128_v30  ;;  %v1222_v46 = vld [vmem:[%s4160_s2 + $0x28] sm:$0xff]  ;;  %v1226_v47 = vunpack.c.l.s8.bf16 %v1218_v43  ;;  %v1217_v44 = vld [vmem:[%s4160_s2] sm:$0xff]  ;;  %v1350_v48 = vld [vmem:[%s4151_s29 + $0x58] sm:$0xff]  ;;  %v1228_v51 = vunpack.c.h.s8.bf16 %v1218_v43 }
 0x33b   : > { %3078 = vmatprep.subr.bf16.mxu0 %v4118_v26  ;;  %3494 = vmatprep.subr.bf16.mxu1 %v4118_v26  ;;  %v1234_v54 = vunpack.c.l.s8.bf16 %v1222_v46  ;;  %v1344_v59 = vld [vmem:[%s4151_s29 + $0x28] sm:$0xff]  ;;  %v1221_v45 = vld [vmem:[%s4160_s2 + $0x20] sm:$0xff]  ;;  %v1349_v49 = vld [vmem:[%s4151_s29 + $0x50] sm:$0xff]  ;;  %v1225_v1 = vunpack.c.l.s8.bf16 %v1217_v44  ;;  %v1236_v56 = vunpack.c.h.s8.bf16 %v1222_v46  ;;  %v1227_v13 = vunpack.c.h.s8.bf16 %v1217_v44 }
 0x33c   : > { %1273 = vmatprep.mubr.bf16.mxu0 %v1226_v47  ;;  %v1348_v7 = vld [vmem:[%s4151_s29 + $0x48] sm:$0xff]  ;;  %v1233_v50 = vunpack.c.l.s8.bf16 %v1221_v45  ;;  %v1351_v63 = vld [vmem:[%s4151_s29 + $0x60] sm:$0xff]  ;;  %v1220_v8 = vld [vmem:[%s4160_s2 + $0x18] sm:$0xff]  ;;  %v1235_v62 = vunpack.c.h.s8.bf16 %v1221_v45 }
 0x33d   : > { %1305 = vmatprep.mubr.bf16.mxu1 %v1234_v54  ;;  %1372 = vperm.xlu1 %3629, %v1342_v55   ;;  %v1352_v57 = vld [vmem:[%s4151_s29 + $0x68] sm:$0xff]  ;;  %v1224_v9 = vld [vmem:[%s4160_s2 + $0x38] sm:$0xff]  ;;  %v1353_v12 = vld [vmem:[%s4151_s29 + $0x70] sm:$0xff]  ;;  %v1230_v15 = vunpack.c.l.s8.bf16 %v1220_v8  ;;  %v1232_v24 = vunpack.c.h.s8.bf16 %v1220_v8 }
 0x33e   : > { %3079 = vmatpush3.bf16.msra.mxu0 %v4116_v25  ;;  %3502 = vmatpush3.bf16.msra.mxu1 %v4116_v25  ;;  %v1354_v11 = vld [vmem:[%s4151_s29 + $0x78] sm:$0xff]  ;;  %v1238_v18 = vunpack.c.l.s8.bf16 %v1224_v9  ;;  %v1219_v19 = vld [vmem:[%s4160_s2 + $0x10] sm:$0xff]  ;;  %v1240_v5 = vunpack.c.h.s8.bf16 %v1224_v9 }
 0x33f   : > { %3080 = vmatprep.subr.bf16.mxu0 %v4122_v29  ;;  %3495 = vmatprep.subr.bf16.mxu1 %v4122_v29  ;;  %v1223_v21 = vld [vmem:[%s4160_s2 + $0x30] sm:$0xff]  ;;  %v1229_v22 = vunpack.c.l.s8.bf16 %v1219_v19  ;;  %v1231_v27 = vunpack.c.h.s8.bf16 %v1219_v19 }
 0x340   : > { %1362 = vperm.xlu0 %3628, %v1340_v58   ;;  %v1237_v23 = vunpack.c.l.s8.bf16 %v1223_v21  ;;  %v1239_v32 = vunpack.c.h.s8.bf16 %v1223_v21 }
 0x341   : > { %1382 = vperm.xlu1 %3629, %v1344_v59  }
 0x342   : > { %3081 = vmatpush3.bf16.msra.mxu0 %v4120_v28  ;;  %3503 = vmatpush3.bf16.msra.mxu1 %v4120_v28 }
 0x343   : > { %3082 = vmatprep.subr.bf16.mxu0 %v4110_v14  ;;  %3496 = vmatprep.subr.bf16.mxu1 %v4110_v14 }
 0x344   : > { %1377 = vperm.xlu0 %3628, %v1343_v2  }
 0x345   : > { %1392 = vperm.xlu1 %3629, %v1346_v3  }
 0x346   : > { %3083 = vmatpush3.bf16.msra.mxu0 %v4108_v4  ;;  %3504 = vmatpush3.bf16.msra.mxu1 %v4108_v4 }
 0x347   : > { %3084 = vmatprep.subr.bf16.mxu0 %v4114_v17  ;;  %3497 = vmatprep.subr.bf16.mxu1 %v4114_v17 }
 0x348   : > { %1387 = vperm.xlu0 %3628, %v1345_v6   ;;  %v4219_v6 = vld [vmem:[%s4442_s6] ss:$0 sm:$0xff]  ;;  %s4287_s6 = smov (%p1207_p7), 0  }
 0x349   : > { %1402 = vperm.xlu1 %3629, %v1348_v7  }
 0x34a   : > { %3085 = vmatpush3.bf16.msra.mxu0 %v4112_v16  ;;  %3505 = vmatpush3.bf16.msra.mxu1 %v4112_v16 }
 0x34b   : > { %3086 = vmatprep.subr.bf16.mxu0 %v4102_v53  ;;  %3498 = vmatprep.subr.bf16.mxu1 %v4102_v53  ;;  %v3635_v53 = vld [vmem:[#allocation9 + $0x10] sm:$0xff] (%p1207_p7)  }
 0x34c   : > { %1397 = vperm.xlu0 %3628, %v1347_v41  }
 0x34d   : > { %1412 = vperm.xlu1 %3629, %v1350_v48  }
 0x34e   : > { %3087 = vmatpush3.bf16.msra.mxu0 %v4100_v52  ;;  %3506 = vmatpush3.bf16.msra.mxu1 %v4100_v52  ;;  %v3634_v52 = vld [vmem:[#allocation9 + $0x18] sm:$0xff] (%p1207_p7)  }
 0x34f   : > { %3088 = vmatprep.subr.bf16.mxu0 %v4106_v61  ;;  %3499 = vmatprep.subr.bf16.mxu1 %v4106_v61  ;;  %v3637_v61 = vld [vmem:[#allocation9] sm:$0xff] (%p1207_p7)  }
 0x350   : > { %1407 = vperm.xlu0 %3628, %v1349_v49  }
 0x351   : > { %1422 = vperm.xlu1 %3629, %v1352_v57  }
 0x352   : > { %3089 = vmatpush3.bf16.msra.mxu0 %v4104_v60  ;;  %3507 = vmatpush3.bf16.msra.mxu1 %v4104_v60  ;;  %v3636_v60 = vld [vmem:[#allocation9 + $0x8] sm:$0xff] (%p1207_p7)  }
 0x354   : > { %1417 = vperm.xlu0 %3628, %v1351_v63  }
 0x355   : > { %1274 = vmatmul.mubr.bf16.vlgmr.msra.gmra.mxu0 %v1225_v1  ;;  %1306 = vmatmul.mubr.bf16.vlgmr.msra.gmra.mxu1 %v1233_v50 }
 0x356   : > { %1281 = vmatprep.mubr.bf16.mxu0 %v1228_v51  ;;  %1313 = vmatprep.mubr.bf16.mxu1 %v1236_v56 }
 0x357   : > { %1432 = vperm.xlu1 %3629, %v1354_v11  }
 0x358   : > { %1427 = vperm.xlu0 %3628, %v1353_v12  }
 0x35d   : > { %1282 = vmatmul.mubr.bf16.gmra.mxu0 %v1227_v13  ;;  %1314 = vmatmul.mubr.bf16.gmra.mxu1 %v1235_v62 }
 0x35e   : > { %1289 = vmatprep.mubr.bf16.mxu0 %v1230_v15  ;;  %1321 = vmatprep.mubr.bf16.mxu1 %v1238_v18 }
 0x365   : > { %1290 = vmatmul.mubr.bf16.gmra.mxu0 %v1229_v22  ;;  %1322 = vmatmul.mubr.bf16.gmra.mxu1 %v1237_v23 }
 0x366   : > { %1297 = vmatprep.mubr.bf16.mxu0 %v1232_v24  ;;  %1329 = vmatprep.mubr.bf16.mxu1 %v1240_v5 }
 0x36d   : > { %1298 = vmatmul.mubr.bf16.gmra.mxu0 %v1231_v27  ;;  %1330 = vmatmul.mubr.bf16.gmra.mxu1 %v1239_v32 }
 0x3b4   : > { %v1358_v33 = vpop.permute.xlu0 %1357  ;;  %v1368_v0 = vpop.permute.xlu1 %1367 }
 0x3b8   : > { %v1373_v10 = vpop.permute.xlu1 %1372 }
 0x3bb   : > { %v1363_v36 = vpop.permute.xlu0 %1362 }
 0x3bc   : > { %v4210_v39 = vpop.permute.xlu1 %1382 }
 0x3bf   : > { %v4208_v37 = vpop.permute.xlu0 %1377 }
 0x3c0   : > { %v4214_v42 = vpop.permute.xlu1 %1392 }
 0x3c3   : > { %v4212_v40 = vpop.permute.xlu0 %1387 }
 0x3c4   : > { %v1403_v44 = vpop.permute.xlu1 %1402 }
 0x3c7   : > { %v1398_v47 = vpop.permute.xlu0 %1397 }
 0x3cb   : > { %v1408_v18 = vpop.permute.xlu0 %1407 }
 0x415   : > { %v3090_v34 = vpop.f32.mrf.mxu0  ;;  %v3114_v35 = vpop.f32.mrf.mxu1 }
 0x417   : > { %v3091_v43 = vpop.f32.mrf.mxu0  ;;  %v3115_v46 = vpop.f32.mrf.mxu1 }
 0x418   : > { %v3092_v54 = vadd.f32 %v3091_v43, %v3090_v34  ;;  %v3116_v55 = vadd.f32 %v3115_v46, %v3114_v35 }
 0x419   : > { %v3093_v58 = vpop.f32.mrf.mxu0  ;;  %v3117_v59 = vpop.f32.mrf.mxu1 }
 0x41a   : > { %v1435_v2 = vmul.f32 %v3092_v54, %v1358_v33  ;;  %v1443_v3 = vmul.f32 %v3116_v55, %v1398_v47  ;;  %v1413_v47 = vpop.permute.xlu1 %1412 }
 0x41b   : > { %v3094_v7 = vpop.f32.mrf.mxu0  ;;  %v3118_v41 = vpop.f32.mrf.mxu1 }
 0x41c   : > { %v3095_v45 = vadd.f32 %v3094_v7, %v3093_v58  ;;  %v3119_v48 = vadd.f32 %v3118_v41, %v3117_v59  ;;  %v1458_v50 = vadd.f32 %v4219_v6, %v1435_v2  ;;  %v1466_v51 = vadd.f32 %v4219_v6, %v1443_v3  ;;  %v1418_v3 = vpop.permute.xlu0 %1417 }
 0x41d   : > { %v3096_v49 = vpop.f32.mrf.mxu0  ;;  %v3120_v1 = vpop.f32.mrf.mxu1 }
 0x41e   : > { %v1436_v56 = vmul.f32 %v3095_v45, %v1363_v36  ;;  %v1444_v57 = vmul.f32 %v3119_v48, %v1403_v44  ;;  %v1474_v19 = vmax.f32 %v1458_v50, 0.0  ;;  %v1482_v21 = vmax.f32 %v1466_v51, 0.0 }
 0x41f   : > { %v3097_v63 = vpop.f32.mrf.mxu0  ;;  %v3121_v8 = vpop.f32.mrf.mxu1 }
 0x420   : > { %v1459_v9 = vadd.f32 %v4219_v6, %v1436_v56  ;;  %v1467_v11 = vadd.f32 %v4219_v6, %v1444_v57  ;;  %v3098_v12 = vadd.f32 %v3097_v63, %v3096_v49  ;;  %v3122_v13 = vadd.f32 %v3121_v8, %v3120_v1 }
 0x421   : > { %v3099_v62 = vpop.f32.mrf.mxu0  ;;  %v3123_v15 = vpop.f32.mrf.mxu1 }
 0x422   : > { %v1475_v22 = vmax.f32 %v1459_v9, 0.0  ;;  %v1483_v23 = vmax.f32 %v1467_v11, 0.0  ;;  %v1437_v24 = vmul.f32 %v3098_v12, %v1368_v0  ;;  %v1445_v5 = vmul.f32 %v3122_v13, %v1408_v18  ;;  %v1423_v9 = vpop.permute.xlu1 %1422 }
 0x423   : > { %v3100_v27 = vpop.f32.mrf.mxu0  ;;  %v3124_v32 = vpop.f32.mrf.mxu1 }
 0x424   : > { %v2864_v33 = vpack.c.bf16 %v1475_v22, %v1474_v19  ;;  %v2884_v36 = vpack.c.bf16 %v1483_v23, %v1482_v21  ;;  %v3101_v34 = vadd.f32 %v3100_v27, %v3099_v62  ;;  %v3125_v35 = vadd.f32 %v3124_v32, %v3123_v15 }
 0x425   : > { %v3102_v43 = vpop.f32.mrf.mxu0  ;;  %v3126_v46 = vpop.f32.mrf.mxu1  ;;  %v1460_v54 = vadd.f32 %v4219_v6, %v1437_v24  ;;  %v1468_v0 = vadd.f32 %v4219_v6, %v1445_v5 }
 0x426   : > { %2865 = vst [vmem:[%s4226_s19] sm:$0xff] %v2864_v33   ;;  %2951 = vst [vmem:[%s4226_s19 + $0x20] sm:$0xff] %v2884_v36   ;;  %v1438_v55 = vmul.f32 %v3101_v34, %v1373_v10  ;;  %v1446_v58 = vmul.f32 %v3125_v35, %v1413_v47  ;;  %v1428_v35 = vpop.permute.xlu0 %1427 }
 0x427   : > { %v3103_v59 = vpop.f32.mrf.mxu0  ;;  %v3127_v2 = vpop.f32.mrf.mxu1  ;;  %v1476_v51 = vmax.f32 %v1460_v54, 0.0  ;;  %v1484_v56 = vmax.f32 %v1468_v0, 0.0 }
 0x428   : > { %v3104_v7 = vadd.f32 %v3103_v59, %v3102_v43  ;;  %v3128_v41 = vadd.f32 %v3127_v2, %v3126_v46  ;;  %v1461_v44 = vadd.f32 %v4219_v6, %v1438_v55  ;;  %v1469_v45 = vadd.f32 %v4219_v6, %v1446_v58 }
 0x429   : > { %v3105_v48 = vpop.f32.mrf.mxu0  ;;  %v3129_v49 = vpop.f32.mrf.mxu1 }
 0x42a   : > { %v1439_v1 = vmul.f32 %v3104_v7, %v4208_v37  ;;  %v1447_v50 = vmul.f32 %v3128_v41, %v1418_v3  ;;  %v1477_v57 = vmax.f32 %v1461_v44, 0.0  ;;  %v1485_v10 = vmax.f32 %v1469_v45, 0.0  ;;  %v1433_v41 = vpop.permute.xlu1 %1432 }
 0x42b   : > { %v3106_v63 = vpop.f32.mrf.mxu0  ;;  %v3130_v8 = vpop.f32.mrf.mxu1 }
 0x42c   : > { %v3107_v11 = vadd.f32 %v3106_v63, %v3105_v48  ;;  %v3131_v12 = vadd.f32 %v3130_v8, %v3129_v49  ;;  %v2869_v13 = vpack.c.bf16 %v1477_v57, %v1476_v51  ;;  %v2889_v62 = vpack.c.bf16 %v1485_v10, %v1484_v56  ;;  %v3631_v8 = vld [vmem:[#allocation9 + $0x30] sm:$0xff] (%p1207_p7)  }
 0x42d   : > { %v3108_v15 = vpop.f32.mrf.mxu0  ;;  %v3132_v18 = vpop.f32.mrf.mxu1  ;;  %v1462_v19 = vadd.f32 %v4219_v6, %v1439_v1  ;;  %v1470_v37 = vadd.f32 %v4219_v6, %v1447_v50 }
 0x42e   : > { %v1440_v21 = vmul.f32 %v3107_v11, %v4210_v39  ;;  %v1448_v22 = vmul.f32 %v3131_v12, %v1423_v9  ;;  %2948 = vst [vmem:[%s4226_s19 + $0x8] sm:$0xff] %v2869_v13   ;;  %2952 = vst [vmem:[%s4226_s19 + $0x28] sm:$0xff] %v2889_v62   ;;  %v3633_v9 = vld [vmem:[#allocation9 + $0x20] sm:$0xff] (%p1207_p7)  }
 0x42f   : > { %v3109_v23 = vpop.f32.mrf.mxu0  ;;  %v3133_v24 = vpop.f32.mrf.mxu1  ;;  %v1478_v43 = vmax.f32 %v1462_v19, 0.0  ;;  %v1486_v46 = vmax.f32 %v1470_v37, 0.0 }
 0x430   : > { %v1463_v5 = vadd.f32 %v4219_v6, %v1440_v21  ;;  %v1471_v27 = vadd.f32 %v4219_v6, %v1448_v22  ;;  %v3110_v32 = vadd.f32 %v3109_v23, %v3108_v15  ;;  %v3134_v33 = vadd.f32 %v3133_v24, %v3132_v18 }
 0x431   : > { %v3111_v36 = vpop.f32.mrf.mxu0  ;;  %v3135_v34 = vpop.f32.mrf.mxu1 }
 0x432   : > { %v1479_v47 = vmax.f32 %v1463_v5, 0.0  ;;  %v1487_v39 = vmax.f32 %v1471_v27, 0.0  ;;  %v1441_v54 = vmul.f32 %v3110_v32, %v4212_v40  ;;  %v1449_v0 = vmul.f32 %v3134_v33, %v1428_v35 }
 0x433   : > { %v3112_v55 = vpop.f32.mrf.mxu0  ;;  %v3136_v58 = vpop.f32.mrf.mxu1 }
 0x434   : > { %v2874_v59 = vpack.c.bf16 %v1479_v47, %v1478_v43  ;;  %v2894_v2 = vpack.c.bf16 %v1487_v39, %v1486_v46  ;;  %v3113_v3 = vadd.f32 %v3112_v55, %v3111_v36  ;;  %v3137_v7 = vadd.f32 %v3136_v58, %v3135_v34 }
 0x435   : > { %v1464_v44 = vadd.f32 %v4219_v6, %v1441_v54  ;;  %v1472_v45 = vadd.f32 %v4219_v6, %v1449_v0 }
 0x436   : > { %2949 = vst [vmem:[%s4226_s19 + $0x10] sm:$0xff] %v2874_v59   ;;  %2953 = vst [vmem:[%s4226_s19 + $0x30] sm:$0xff] %v2894_v2   ;;  %v1442_v48 = vmul.f32 %v3113_v3, %v4214_v42  ;;  %v1450_v49 = vmul.f32 %v3137_v7, %v1433_v41  ;;  %v3630_v42 = vld [vmem:[#allocation9 + $0x38] sm:$0xff] (%p1207_p7)  }
 0x437   : > { %v1480_v50 = vmax.f32 %v1464_v44, 0.0  ;;  %v1488_v51 = vmax.f32 %v1472_v45, 0.0  ;;  %3361 = vmatprep.subr.bf16.mxu0 (%p1207_p7), %v3630_v42  ;;  %3508 = vmatprep.subr.bf16.mxu1 (%p1207_p7), %v3630_v42 }
 0x438   : > { %v1465_v40 = vadd.f32 %v4219_v6, %v1442_v48  ;;  %v1473_v1 = vadd.f32 %v4219_v6, %v1450_v49  ;;  %3362 = vmatpush3.bf16.msra.mxu0 (%p1207_p7), %v3630_v42  ;;  %3516 = vmatpush3.bf16.msra.mxu1 (%p1207_p7), %v3630_v42  ;;  %v3632_v6 = vld [vmem:[#allocation9 + $0x28] sm:$0xff] (%p1207_p7)  }
 0x439   :  { %3363 = vmatprep.subr.bf16.mxu0 (%p1207_p7), %v3631_v8  ;;  %3509 = vmatprep.subr.bf16.mxu1 (%p1207_p7), %v3631_v8 }
 0x43a   : > { %v1481_v56 = vmax.f32 %v1465_v40, 0.0  ;;  %v1489_v57 = vmax.f32 %v1473_v1, 0.0  ;;  %1209 = sbr.rel (!%p1207_p7) target bundleno = 821 (0x335), region = 125 }
 0x43c   : > { %v2879_v10 = vpack.c.bf16 %v1481_v56, %v1480_v50  ;;  %v2899_v63 = vpack.c.bf16 %v1489_v57, %v1488_v51  ;;  %3364 = vmatpush3.bf16.msra.mxu0 (%p1207_p7), %v3631_v8  ;;  %3517 = vmatpush3.bf16.msra.mxu1 (%p1207_p7), %v3631_v8 }
 0x43d   :  { %3365 = vmatprep.subr.bf16.mxu0 (%p1207_p7), %v3632_v6  ;;  %3510 = vmatprep.subr.bf16.mxu1 (%p1207_p7), %v3632_v6 }
 0x43e   : > { %2950 = vst [vmem:[%s4226_s19 + $0x18] sm:$0xff] %v2879_v10   ;;  %2954 = vst [vmem:[%s4226_s19 + $0x38] sm:$0xff] %v2899_v63  }
 0x440   :  { %3366 = vmatpush3.bf16.msra.mxu0 %v3632_v6  ;;  %3518 = vmatpush3.bf16.msra.mxu1 %v3632_v6 }
 0x441   :  { %3367 = vmatprep.subr.bf16.mxu0 %v3633_v9  ;;  %3511 = vmatprep.subr.bf16.mxu1 %v3633_v9 }
 0x444   :  { %3368 = vmatpush3.bf16.msra.mxu0 %v3633_v9  ;;  %3519 = vmatpush3.bf16.msra.mxu1 %v3633_v9 }
 0x445   :  { %v3638_v11 = vld [vmem:[#allocation3] sm:$0xff]   ;;  %3369 = vmatprep.subr.bf16.mxu0 %v3634_v52  ;;  %3512 = vmatprep.subr.bf16.mxu1 %v3634_v52  ;;  %v3640_v4 = vld [vmem:[#allocation3 + $0x8] sm:$0xff]   ;;  %v3642_v16 = vld [vmem:[#allocation3 + $0x10] sm:$0xff]  }
 0x446   :  { %v3639_v12 = vld [vmem:[#allocation3 + $0x40] sm:$0xff]   ;;  %3377 = vmatprep.mubr.bf16.mxu0 %v3638_v11  ;;  %v3641_v14 = vld [vmem:[#allocation3 + $0x48] sm:$0xff]   ;;  %v3643_v17 = vld [vmem:[#allocation3 + $0x50] sm:$0xff]  }
 0x447   :  { %3393 = vmatprep.mubr.bf16.mxu1 %v3639_v12  ;;  %v3644_v25 = vld [vmem:[#allocation3 + $0x18] sm:$0xff]   ;;  %v3646_v28 = vld [vmem:[#allocation3 + $0x20] sm:$0xff]   ;;  %v3648_v20 = vld [vmem:[#allocation3 + $0x28] sm:$0xff]  }
 0x448   :  { %3370 = vmatpush3.bf16.msra.mxu0 %v3634_v52  ;;  %3520 = vmatpush3.bf16.msra.mxu1 %v3634_v52  ;;  %v3645_v26 = vld [vmem:[#allocation3 + $0x58] sm:$0xff]   ;;  %v3647_v29 = vld [vmem:[#allocation3 + $0x60] sm:$0xff]   ;;  %v3649_v38 = vld [vmem:[#allocation3 + $0x68] sm:$0xff]  }
 0x449   :  { %3371 = vmatprep.subr.bf16.mxu0 %v3635_v53  ;;  %3513 = vmatprep.subr.bf16.mxu1 %v3635_v53  ;;  %v3650_v30 = vld [vmem:[#allocation3 + $0x30] sm:$0xff]   ;;  %v3652_v13 = vld [vmem:[#allocation3 + $0x38] sm:$0xff]  }
 0x44a   :  { %v3651_v31 = vld [vmem:[#allocation3 + $0x70] sm:$0xff]   ;;  %v3653_v62 = vld [vmem:[#allocation3 + $0x78] sm:$0xff]  }
 0x44c   :  { %3372 = vmatpush3.bf16.msra.mxu0 %v3635_v53  ;;  %3521 = vmatpush3.bf16.msra.mxu1 %v3635_v53 }
 0x44d   :  { %3373 = vmatprep.subr.bf16.mxu0 %v3636_v60  ;;  %3514 = vmatprep.subr.bf16.mxu1 %v3636_v60 }
 0x450   :  { %3374 = vmatpush3.bf16.msra.mxu0 %v3636_v60  ;;  %3522 = vmatpush3.bf16.msra.mxu1 %v3636_v60 }
 0x451   :  { %3375 = vmatprep.subr.bf16.mxu0 %v3637_v61  ;;  %3515 = vmatprep.subr.bf16.mxu1 %v3637_v61 }
 0x454   :  { %3376 = vmatpush3.bf16.msra.mxu0 %v3637_v61  ;;  %3523 = vmatpush3.bf16.msra.mxu1 %v3637_v61 }
 0x457   :  { %3378 = vmatmul.mubr.bf16.vlgmr.msra.gmra.mxu0 %v3640_v4  ;;  %3394 = vmatmul.mubr.bf16.vlgmr.msra.gmra.mxu1 %v3641_v14 }
 0x458   :  { %3381 = vmatprep.mubr.bf16.mxu0 %v3642_v16  ;;  %3397 = vmatprep.mubr.bf16.mxu1 %v3643_v17 }
 0x45f   :  { %3382 = vmatmul.mubr.bf16.gmra.mxu0 %v3644_v25  ;;  %3398 = vmatmul.mubr.bf16.gmra.mxu1 %v3645_v26 }
 0x460   :  { %3385 = vmatprep.mubr.bf16.mxu0 %v3646_v28  ;;  %3401 = vmatprep.mubr.bf16.mxu1 %v3647_v29 }
 0x467   :  { %3386 = vmatmul.mubr.bf16.gmra.mxu0 %v3648_v20  ;;  %3402 = vmatmul.mubr.bf16.gmra.mxu1 %v3649_v38 }
 0x468   :  { %3389 = vmatprep.mubr.bf16.mxu0 %v3650_v30  ;;  %3405 = vmatprep.mubr.bf16.mxu1 %v3651_v31 }
 0x46f   :  { %3390 = vmatmul.mubr.bf16.gmra.mxu0 %v3652_v13  ;;  %3406 = vmatmul.mubr.bf16.gmra.mxu1 %v3653_v62 }
 0x517   :  { %v3379_v15 = vpop.f32.mrf.mxu0  ;;  %v3395_v18 = vpop.f32.mrf.mxu1 }
 0x519   :  { %v1800_v19 = vpop.f32.mrf.mxu0  ;;  %v1864_v37 = vpop.f32.mrf.mxu1 }
 0x51b   :  { %v3380_v21 = vpop.f32.mrf.mxu0  ;;  %v3396_v22 = vpop.f32.mrf.mxu1 }
 0x51c   :  { %v4255_v23 = vpack.c.bf16 %v3380_v21, %v3379_v15  ;;  %v4257_v24 = vpack.c.bf16 %v3396_v22, %v3395_v18 }
 0x51d   :  { %v1803_v5 = vpop.f32.mrf.mxu0  ;;  %v1867_v27 = vpop.f32.mrf.mxu1 }
 0x51e   :  { %v4259_v32 = vpack.c.bf16 %v1803_v5, %v1800_v19  ;;  %v4261_v33 = vpack.c.bf16 %v1867_v27, %v1864_v37 }
 0x51f   :  { %v3383_v36 = vpop.f32.mrf.mxu0  ;;  %v3399_v34 = vpop.f32.mrf.mxu1 }
 0x521   :  { %v1816_v35 = vpop.f32.mrf.mxu0  ;;  %v1880_v43 = vpop.f32.mrf.mxu1 }
 0x523   :  { %v3384_v46 = vpop.f32.mrf.mxu0  ;;  %v3400_v47 = vpop.f32.mrf.mxu1 }
 0x524   :  { %v4263_v39 = vpack.c.bf16 %v3384_v46, %v3383_v36  ;;  %v4265_v54 = vpack.c.bf16 %v3400_v47, %v3399_v34 }
 0x525   :  { %v1819_v0 = vpop.f32.mrf.mxu0  ;;  %v1883_v55 = vpop.f32.mrf.mxu1 }
 0x526   :  { %v4267_v58 = vpack.c.bf16 %v1819_v0, %v1816_v35  ;;  %v4269_v59 = vpack.c.bf16 %v1883_v55, %v1880_v43 }
 0x527   :  { %v3387_v2 = vpop.f32.mrf.mxu0  ;;  %v3403_v3 = vpop.f32.mrf.mxu1 }
 0x529   :  { %v1832_v7 = vpop.f32.mrf.mxu0  ;;  %v1896_v41 = vpop.f32.mrf.mxu1 }
 0x52b   :  { %v3388_v44 = vpop.f32.mrf.mxu0  ;;  %v3404_v45 = vpop.f32.mrf.mxu1 }
 0x52c   :  { %v4271_v48 = vpack.c.bf16 %v3388_v44, %v3387_v2  ;;  %v4273_v49 = vpack.c.bf16 %v3404_v45, %v3403_v3 }
 0x52d   :  { %v1835_v40 = vpop.f32.mrf.mxu0  ;;  %v1899_v1 = vpop.f32.mrf.mxu1 }
 0x52e   :  { %v4275_v50 = vpack.c.bf16 %v1835_v40, %v1832_v7  ;;  %v4277_v51 = vpack.c.bf16 %v1899_v1, %v1896_v41 }
 0x52f   :  { %v3391_v56 = vpop.f32.mrf.mxu0  ;;  %v3407_v57 = vpop.f32.mrf.mxu1 }
 0x531   :  { %v1848_v10 = vpop.f32.mrf.mxu0  ;;  %v1912_v63 = vpop.f32.mrf.mxu1 }
 0x533   :  { %v3392_v42 = vpop.f32.mrf.mxu0  ;;  %v3408_v8 = vpop.f32.mrf.mxu1 }
 0x534   :  { %v4279_v6 = vpack.c.bf16 %v3392_v42, %v3391_v56  ;;  %v4281_v9 = vpack.c.bf16 %v3408_v8, %v3407_v57 }
 0x535   :  { %v1851_v11 = vpop.f32.mrf.mxu0  ;;  %v1915_v12 = vpop.f32.mrf.mxu1 }
 0x536   :  { %v4283_v52 = vpack.c.bf16 %v1851_v11, %v1848_v10  ;;  %v4285_v53 = vpack.c.bf16 %v1915_v12, %v1912_v63 }
 0x537 LB: > { %3162 = vmatprep.subr.bf16.mxu0 %v4281_v9  ;;  %3524 = vmatprep.subr.bf16.mxu1 %v4281_v9  ;;  %s4299_s5 = sshll.u32 %s3804_s6, 7  ;;  %v3816_v60 = vmov 0   ;;  %s1948_s6 = sadd.s32 1, %s3804_s6   ;;  %s3804_s6 = sphi %s4287_s6, %s1948_s6  }
 0x538   : > { %3163 = vmatpush3.bf16.msra.mxu0 %v4279_v6  ;;  %3532 = vmatpush3.bf16.msra.mxu1 %v4279_v6  ;;  %s1950_s20 = sshra.s32 %s4299_s5, 5  ;;  %s4306_s22 = scalar_lea.vmem %s4437_s1, %s4299_s5 }
 0x539   : > { %3164 = vmatprep.subr.bf16.mxu0 %v4285_v53  ;;  %3525 = vmatprep.subr.bf16.mxu1 %v4285_v53  ;;  %s2804_s23 = sshll.u32 %s1950_s20, 4  ;;  %v2079_v61 = vld [vmem:[%s4306_s22 + $0x10] sm:$0xff]  ;;  %v2077_v4 = vld [vmem:[%s4306_s22] sm:$0xff]  ;;  %v2080_v26 = vld [vmem:[%s4306_s22 + $0x18] sm:$0xff]  ;;  %s2276_s4 = sshra.s32 %s4299_s5, 3 }
 0x53a   : > { %3655 = vset.pattern.permute.xlu1 %v3816_v60  ;;  %3654 = vset.pattern.permute.xlu0 %v3816_v60  ;;  %s4315_s10 = scalar_lea.vmem %s4436_s0, %s2804_s23  ;;  %v2078_v28 = vld [vmem:[%s4306_s22 + $0x8] sm:$0xff]  ;;  %v2081_v20 = vld [vmem:[%s4306_s22 + $0x20] sm:$0xff]  ;;  %v2084_v38 = vld [vmem:[%s4306_s22 + $0x38] sm:$0xff]  ;;  %s2750_s27 = sshll.u32 %s2276_s4, 2 }
 0x53b   : > { %v1956_v14 = vld [vmem:[%s4315_s10 + $0x8] sm:$0xff]  ;;  %2105 = vperm.xlu1 %3655, %v2079_v61   ;;  %2095 = vperm.xlu0 %3654, %v2077_v4   ;;  %v2083_v30 = vld [vmem:[%s4306_s22 + $0x30] sm:$0xff]  ;;  %v2085_v13 = vld [vmem:[%s4306_s22 + $0x40] sm:$0xff]  ;;  %s4381_s28 = scalar_lea.vmem [#allocation2], %s2750_s27  ;;  %p1945_p8 = scmp.ge.s32.totalorder %s1948_s6, 2  }
 0x53c   : > { %3165 = vmatpush3.bf16.msra.mxu0 %v4283_v52  ;;  %3533 = vmatpush3.bf16.msra.mxu1 %v4283_v52  ;;  %v1960_v16 = vld [vmem:[%s4315_s10 + $0x28] sm:$0xff]  ;;  %v1964_v17 = vunpack.c.l.s8.bf16 %v1956_v14  ;;  %v1955_v62 = vld [vmem:[%s4315_s10] sm:$0xff]  ;;  %v2088_v18 = vld [vmem:[%s4306_s22 + $0x58] sm:$0xff]  ;;  %v1966_v22 = vunpack.c.h.s8.bf16 %v1956_v14  ;;  %vm3818_vm0 = vmmov (%p1945_p8), 0   ;;  %s3819_s29 = smov (%p1945_p8), [#allocation12]  }
 0x53d   : > { %3166 = vmatprep.subr.bf16.mxu0 %v4273_v49  ;;  %3526 = vmatprep.subr.bf16.mxu1 %v4273_v49  ;;  %v1972_v25 = vunpack.c.l.s8.bf16 %v1960_v16  ;;  %v2082_v29 = vld [vmem:[%s4306_s22 + $0x28] sm:$0xff]  ;;  %v1959_v15 = vld [vmem:[%s4315_s10 + $0x20] sm:$0xff]  ;;  %v2087_v19 = vld [vmem:[%s4306_s22 + $0x50] sm:$0xff]  ;;  %v1963_v37 = vunpack.c.l.s8.bf16 %v1955_v62  ;;  %v1974_v5 = vunpack.c.h.s8.bf16 %v1960_v16  ;;  %v1965_v47 = vunpack.c.h.s8.bf16 %v1955_v62  ;;  %s2572_s30 = sshll.u32 (%p1945_p8), %s3819_s29, 4  ;;  %s2573_s30 = int_to_ptr.vmem [resolvable:$true] %s2572_s30 }
 0x53e   : > { %2011 = vmatprep.mubr.bf16.mxu0 %v1964_v17  ;;  %v2086_v31 = vld [vmem:[%s4306_s22 + $0x48] sm:$0xff]  ;;  %v1971_v21 = vunpack.c.l.s8.bf16 %v1959_v15  ;;  %v2089_v36 = vld [vmem:[%s4306_s22 + $0x60] sm:$0xff]  ;;  %v1958_v34 = vld [vmem:[%s4315_s10 + $0x18] sm:$0xff]  ;;  %v1973_v0 = vunpack.c.h.s8.bf16 %v1959_v15  ;;  %s3754_s13 = scalar_lea.vmem (%p1945_p8), %s2573_s30, 128  ;;  %p3759_p10 = scmp.lt.s32.totalorder (%p1945_p8), %s2573_s30, %s2573_s30 }
 0x53f   : > { %2043 = vmatprep.mubr.bf16.mxu1 %v1972_v25  ;;  %2110 = vperm.xlu1 %3655, %v2080_v26   ;;  %v2090_v27 = vld [vmem:[%s4306_s22 + $0x68] sm:$0xff]  ;;  %v1962_v35 = vld [vmem:[%s4315_s10 + $0x38] sm:$0xff]  ;;  %v2091_v46 = vld [vmem:[%s4306_s22 + $0x70] sm:$0xff]  ;;  %v1968_v55 = vunpack.c.l.s8.bf16 %v1958_v34  ;;  %v1970_v45 = vunpack.c.h.s8.bf16 %v1958_v34  ;;  %p3755_p9 = scmp.ne.s32.totalorder (%p1945_p8), %s2573_s30, %s3754_s13  ;;  %p3760_p11 = scmp.lt.s32.totalorder (%p1945_p8), %s3754_s13, %s3754_s13 }
 0x540   : > { %3167 = vmatpush3.bf16.msra.mxu0 %v4271_v48  ;;  %3534 = vmatpush3.bf16.msra.mxu1 %v4271_v48  ;;  %v2092_v43 = vld [vmem:[%s4306_s22 + $0x78] sm:$0xff]  ;;  %v1976_v2 = vunpack.c.l.s8.bf16 %v1962_v35  ;;  %v1957_v3 = vld [vmem:[%s4315_s10 + $0x10] sm:$0xff]  ;;  %v1978_v40 = vunpack.c.h.s8.bf16 %v1962_v35  ;;  %v4375_v62 = vld [vmem:[%s4444_s8] ss:$0 sm:$0xff] }
 0x541   : > { %3168 = vmatprep.subr.bf16.mxu0 %v4277_v51  ;;  %3527 = vmatprep.subr.bf16.mxu1 %v4277_v51  ;;  %v1961_v7 = vld [vmem:[%s4315_s10 + $0x30] sm:$0xff]  ;;  %v1967_v41 = vunpack.c.l.s8.bf16 %v1957_v3  ;;  %v1969_v1 = vunpack.c.h.s8.bf16 %v1957_v3  ;;  %v2484_v49 = vld [vmem:[#allocation10 + $0x60] sm:$0xff] (%p1945_p8)  ;;  %v2483_v51 = vld [vmem:[#allocation10 + $0x58] sm:$0xff] (%p1945_p8)  ;;  %p3761_p12 = por (%p1945_p8), %p3760_p11, %p3759_p10 }
 0x542   : > { %2100 = vperm.xlu0 %3654, %v2078_v28   ;;  %v1975_v44 = vunpack.c.l.s8.bf16 %v1961_v7  ;;  %v1977_v56 = vunpack.c.h.s8.bf16 %v1961_v7  ;;  %v2482_v9 = vld [vmem:[#allocation10 + $0x50] sm:$0xff] (%p1945_p8)  ;;  %v2481_v53 = vld [vmem:[#allocation10 + $0x48] sm:$0xff] (%p1945_p8) }
 0x543   : > { %2120 = vperm.xlu1 %3655, %v2082_v29   ;;  %p3762_p13 = pnand (%p1945_p8), %p3761_p12, %p3755_p9 }
 0x544   : > { %3169 = vmatpush3.bf16.msra.mxu0 %v4275_v50  ;;  %3535 = vmatpush3.bf16.msra.mxu1 %v4275_v50 }
 0x545   : > { %3170 = vmatprep.subr.bf16.mxu0 %v4265_v54  ;;  %3528 = vmatprep.subr.bf16.mxu1 %v4265_v54  ;;  %v2486_v54 = vld [vmem:[#allocation10 + $0x70] sm:$0xff] (%p1945_p8) }
 0x546   : > { %2115 = vperm.xlu0 %3654, %v2081_v20  }
 0x547   : > { %2130 = vperm.xlu1 %3655, %v2084_v38  }
 0x548   : > { %3171 = vmatpush3.bf16.msra.mxu0 %v4263_v39  ;;  %3536 = vmatpush3.bf16.msra.mxu1 %v4263_v39 }
 0x549   : > { %3172 = vmatprep.subr.bf16.mxu0 %v4269_v59  ;;  %3529 = vmatprep.subr.bf16.mxu1 %v4269_v59  ;;  %v2485_v59 = vld [vmem:[#allocation10 + $0x68] sm:$0xff] (%p1945_p8) }
 0x54a   : > { %2125 = vperm.xlu0 %3654, %v2083_v30  }
 0x54b   : > { %2140 = vperm.xlu1 %3655, %v2086_v31  }
 0x54c   : > { %3173 = vmatpush3.bf16.msra.mxu0 %v4267_v58  ;;  %3537 = vmatpush3.bf16.msra.mxu1 %v4267_v58 }
 0x54d   : > { %3174 = vmatprep.subr.bf16.mxu0 %v4257_v24  ;;  %3530 = vmatprep.subr.bf16.mxu1 %v4257_v24 }
 0x54e   : > { %2135 = vperm.xlu0 %3654, %v2085_v13  }
 0x54f   : > { %2150 = vperm.xlu1 %3655, %v2088_v18  }
 0x550   : > { %3175 = vmatpush3.bf16.msra.mxu0 %v4255_v23  ;;  %3538 = vmatpush3.bf16.msra.mxu1 %v4255_v23 }
 0x551   : > { %3176 = vmatprep.subr.bf16.mxu0 %v4261_v33  ;;  %3531 = vmatprep.subr.bf16.mxu1 %v4261_v33  ;;  %v2487_v33 = vld [vmem:[#allocation10 + $0x78] sm:$0xff] (%p1945_p8) }
 0x552   : > { %2145 = vperm.xlu0 %3654, %v2087_v19  }
 0x553   : > { %2160 = vperm.xlu1 %3655, %v2090_v27  }
 0x554   : > { %3177 = vmatpush3.bf16.msra.mxu0 %v4259_v32  ;;  %3539 = vmatpush3.bf16.msra.mxu1 %v4259_v32  ;;  %v2296_v32 = vld [vmem:[%s4445_s9] sm:$0xff] (%p1945_p8) }
 0x555   :  { %v2752_v39 = vcombine.high (%p1945_p8), %v2296_v32, %v2296_v32 }
 0x556   : > { %2155 = vperm.xlu0 %3654, %v2089_v36  }
 0x557   : > { %2012 = vmatmul.mubr.bf16.vlgmr.msra.gmra.mxu0 %v1963_v37  ;;  %2044 = vmatmul.mubr.bf16.vlgmr.msra.gmra.mxu1 %v1971_v21 }
 0x558   : > { %2019 = vmatprep.mubr.bf16.mxu0 %v1966_v22  ;;  %2051 = vmatprep.mubr.bf16.mxu1 %v1974_v5 }
 0x559   : > { %2170 = vperm.xlu1 %3655, %v2092_v43  }
 0x55a   : > { %2165 = vperm.xlu0 %3654, %v2091_v46  }
 0x55f   : > { %2020 = vmatmul.mubr.bf16.gmra.mxu0 %v1965_v47  ;;  %2052 = vmatmul.mubr.bf16.gmra.mxu1 %v1973_v0 }
 0x560   : > { %2027 = vmatprep.mubr.bf16.mxu0 %v1968_v55  ;;  %2059 = vmatprep.mubr.bf16.mxu1 %v1976_v2 }
 0x567   : > { %2028 = vmatmul.mubr.bf16.gmra.mxu0 %v1967_v41  ;;  %2060 = vmatmul.mubr.bf16.gmra.mxu1 %v1975_v44 }
 0x568   : > { %2035 = vmatprep.mubr.bf16.mxu0 %v1970_v45  ;;  %2067 = vmatprep.mubr.bf16.mxu1 %v1978_v40 }
 0x56f   : > { %2036 = vmatmul.mubr.bf16.gmra.mxu0 %v1969_v1  ;;  %2068 = vmatmul.mubr.bf16.gmra.mxu1 %v1977_v56 }
 0x570   :  { %2464 = vmatprep.mubr.bf16.mxu0 (%p1945_p8), %v2752_v39 }
 0x5b6   : > { %v2096_v57 = vpop.permute.xlu0 %2095  ;;  %v2106_v10 = vpop.permute.xlu1 %2105 }
 0x5ba   : > { %v2111_v42 = vpop.permute.xlu1 %2110 }
 0x5bd   : > { %v2101_v63 = vpop.permute.xlu0 %2100 }
 0x5be   : > { %v4365_v11 = vpop.permute.xlu1 %2120 }
 0x5c1   : > { %v4363_v8 = vpop.permute.xlu0 %2115 }
 0x5c2   : > { %v4369_v4 = vpop.permute.xlu1 %2130 }
 0x5c5   : > { %v4367_v12 = vpop.permute.xlu0 %2125 }
 0x5c6   : > { %v2141_v13 = vpop.permute.xlu1 %2140 }
 0x5c9   : > { %v2136_v29 = vpop.permute.xlu0 %2135 }
 0x5ca   : > { %v2151_v1 = vpop.permute.xlu1 %2150 }
 0x5cd   : > { %v2146_v2 = vpop.permute.xlu0 %2145 }
 0x617   : > { %v3178_v60 = vpop.f32.mrf.mxu0  ;;  %v3202_v61 = vpop.f32.mrf.mxu1 }
 0x619   : > { %v3179_v14 = vpop.f32.mrf.mxu0  ;;  %v3203_v16 = vpop.f32.mrf.mxu1 }
 0x61a   : > { %v3180_v17 = vadd.f32 %v3179_v14, %v3178_v60  ;;  %v3204_v25 = vadd.f32 %v3203_v16, %v3202_v61 }
 0x61b   : > { %v3181_v26 = vpop.f32.mrf.mxu0  ;;  %v3205_v28 = vpop.f32.mrf.mxu1 }
 0x61c   : > { %v2173_v20 = vmul.f32 %v3180_v17, %v2096_v57  ;;  %v2181_v38 = vmul.f32 %v3204_v25, %v2136_v29 }
 0x61d   : > { %v3182_v30 = vpop.f32.mrf.mxu0  ;;  %v3206_v31 = vpop.f32.mrf.mxu1 }
 0x61e   : > { %v3183_v15 = vadd.f32 %v3182_v30, %v3181_v26  ;;  %v3207_v18 = vadd.f32 %v3206_v31, %v3205_v28  ;;  %v2196_v5 = vadd.f32 %v4375_v62, %v2173_v20  ;;  %v2204_v27 = vadd.f32 %v4375_v62, %v2181_v38  ;;  %v2156_v31 = vpop.permute.xlu0 %2155 }
 0x61f   : > { %v3184_v19 = vpop.f32.mrf.mxu0  ;;  %v3208_v37 = vpop.f32.mrf.mxu1 }
 0x620   : > { %v2174_v21 = vmul.f32 %v3183_v15, %v2101_v63  ;;  %v2182_v22 = vmul.f32 %v3207_v18, %v2141_v13 }
 0x621   : > { %v3185_v36 = vpop.f32.mrf.mxu0  ;;  %v3209_v34 = vpop.f32.mrf.mxu1 }
 0x622   : > { %v2197_v35 = vadd.f32 %v4375_v62, %v2174_v21  ;;  %v2205_v43 = vadd.f32 %v4375_v62, %v2182_v22  ;;  %v3186_v46 = vadd.f32 %v3185_v36, %v3184_v19  ;;  %v3210_v47 = vadd.f32 %v3209_v34, %v3208_v37  ;;  %v2161_v21 = vpop.permute.xlu1 %2160 }
 0x623   : > { %v3187_v0 = vpop.f32.mrf.mxu0  ;;  %v3211_v55 = vpop.f32.mrf.mxu1 }
 0x624   : > { %v2904_v3 = vpack.c.bf16 %v2197_v35, %v2196_v5  ;;  %v2924_v7 = vpack.c.bf16 %v2205_v43, %v2204_v27  ;;  %v2175_v41 = vmul.f32 %v3186_v46, %v2106_v10  ;;  %v2183_v44 = vmul.f32 %v3210_v47, %v2146_v2 }
 0x625   : > { %v3188_v45 = vpop.f32.mrf.mxu0  ;;  %v3212_v40 = vpop.f32.mrf.mxu1 }
 0x626   : > { %2905 = vst [vmem:[%s4381_s28] sm:$0xff] %v2904_v3   ;;  %2958 = vst [vmem:[%s4381_s28 + $0x20] sm:$0xff] %v2924_v7   ;;  %v3189_v56 = vadd.f32 %v3188_v45, %v3187_v0  ;;  %v3213_v57 = vadd.f32 %v3212_v40, %v3211_v55  ;;  %v2198_v16 = vadd.f32 %v4375_v62, %v2175_v41 }
 0x627   : > { %v3190_v63 = vpop.f32.mrf.mxu0  ;;  %v3214_v60 = vpop.f32.mrf.mxu1  ;;  %v2206_v10 = vadd.f32 %v4375_v62, %v2183_v44 }
 0x628   : > { %v2176_v61 = vmul.f32 %v3189_v56, %v2111_v42  ;;  %v2184_v14 = vmul.f32 %v3213_v57, %v2151_v1  ;;  %v2166_v44 = vpop.permute.xlu0 %2165 }
 0x629   : > { %v3191_v17 = vpop.f32.mrf.mxu0  ;;  %v3215_v25 = vpop.f32.mrf.mxu1 }
 0x62a   : > { %v2199_v26 = vadd.f32 %v4375_v62, %v2176_v61  ;;  %v2207_v28 = vadd.f32 %v4375_v62, %v2184_v14  ;;  %v3192_v29 = vadd.f32 %v3191_v17, %v3190_v63  ;;  %v3216_v20 = vadd.f32 %v3215_v25, %v3214_v60  ;;  %v2171_v61 = vpop.permute.xlu1 %2170 }
 0x62b   : > { %v3193_v38 = vpop.f32.mrf.mxu0  ;;  %v3217_v30 = vpop.f32.mrf.mxu1 }
 0x62c   : > { %v2909_v13 = vpack.c.bf16 %v2199_v26, %v2198_v16  ;;  %v2929_v42 = vpack.c.bf16 %v2207_v28, %v2206_v10  ;;  %v2177_v15 = vmul.f32 %v3192_v29, %v4363_v8  ;;  %v2185_v18 = vmul.f32 %v3216_v20, %v2156_v31 }
 0x62d   : > { %v3194_v19 = vpop.f32.mrf.mxu0  ;;  %v3218_v37 = vpop.f32.mrf.mxu1  ;;  %v3817_v20 = vmov (%p1945_p8), 0.0  }
 0x62e   : > { %2955 = vst [vmem:[%s4381_s28 + $0x8] sm:$0xff] %v2909_v13   ;;  %2959 = vst [vmem:[%s4381_s28 + $0x28] sm:$0xff] %v2929_v42   ;;  %v3195_v22 = vadd.f32 %v3194_v19, %v3193_v38  ;;  %v3219_v5 = vadd.f32 %v3218_v37, %v3217_v30  ;;  %v2200_v43 = vadd.f32 %v4375_v62, %v2177_v15  ;;  %3409 = vmatprep.subr.mxu1 (%p1945_p8), %v3817_v20  ;;  %v2479_v37 = vld [vmem:[#allocation10 + $0x38] sm:$0xff] (%p1945_p8) }
 0x62f   : > { %v3196_v27 = vpop.f32.mrf.mxu0  ;;  %v3220_v36 = vpop.f32.mrf.mxu1  ;;  %v2208_v46 = vadd.f32 %v4375_v62, %v2185_v18  ;;  %3410 = vmatpush3.msra.mxu1 (%p1945_p8), %v2487_v33  ;;  %v2480_v18 = vld [vmem:[#allocation10 + $0x40] sm:$0xff] (%p1945_p8)  ;;  %v2751_v19 = vcombine.low (%p1945_p8), %v2296_v32, %v2296_v32  ;;  %3441 = vmatprep.mubr.msk.f32.mxu1 (%p1945_p8), %vm3818_vm0, %v3817_v20 }
 0x630   : > { %v2178_v34 = vmul.f32 %v3195_v22, %v4365_v11  ;;  %v2186_v35 = vmul.f32 %v3219_v5, %v2161_v21  ;;  %3411 = vmatprep.subr.mxu1 (%p1945_p8), %v3817_v20  ;;  %v2478_v21 = vld [vmem:[#allocation10 + $0x30] sm:$0xff] (%p1945_p8)  ;;  %v2477_v22 = vld [vmem:[#allocation10 + $0x28] sm:$0xff] (%p1945_p8)  ;;  %v2476_v5 = vld [vmem:[#allocation10 + $0x20] sm:$0xff] (%p1945_p8) }
 0x631   : > { %v3197_v8 = vpop.f32.mrf.mxu0  ;;  %v3221_v47 = vpop.f32.mrf.mxu1  ;;  %3412 = vmatpush3.msra.mxu1 (%p1945_p8), %v2486_v54 }
 0x632   : > { %v2201_v0 = vadd.f32 %v4375_v62, %v2178_v34  ;;  %v2209_v55 = vadd.f32 %v4375_v62, %v2186_v35  ;;  %v3198_v2 = vadd.f32 %v3197_v8, %v3196_v27  ;;  %v3222_v3 = vadd.f32 %v3221_v47, %v3220_v36  ;;  %3413 = vmatprep.subr.mxu1 (%p1945_p8), %v3817_v20  ;;  %v2475_v27 = vld [vmem:[#allocation10 + $0x18] sm:$0xff] (%p1945_p8)  ;;  %v2474_v36 = vld [vmem:[#allocation10 + $0x10] sm:$0xff] (%p1945_p8)  ;;  %v2473_v34 = vld [vmem:[#allocation10 + $0x8] sm:$0xff] (%p1945_p8) }
 0x633   : > { %v3199_v7 = vpop.f32.mrf.mxu0  ;;  %v3223_v41 = vpop.f32.mrf.mxu1  ;;  %3414 = vmatpush3.msra.mxu1 (%p1945_p8), %v2485_v59  ;;  %v2472_v35 = vld [vmem:[#allocation10] sm:$0xff] (%p1945_p8) }
 0x634   : > { %v2914_v45 = vpack.c.bf16 %v2201_v0, %v2200_v43  ;;  %v2934_v11 = vpack.c.bf16 %v2209_v55, %v2208_v46  ;;  %v2179_v56 = vmul.f32 %v3198_v2, %v4367_v12  ;;  %v2187_v57 = vmul.f32 %v3222_v3, %v2166_v44  ;;  %3415 = vmatprep.subr.mxu1 (%p1945_p8), %v3817_v20  ;;  %v2769_v55 = vld [vmem:[%s4447_s11] ss:$0 sm:$0xff] (%p1945_p8) }
 0x635   : > { %v3200_v40 = vpop.f32.mrf.mxu0  ;;  %v3224_v1 = vpop.f32.mrf.mxu1  ;;  %3416 = vmatpush3.msra.mxu1 (%p1945_p8), %v2484_v49 }
 0x636   : > { %2956 = vst [vmem:[%s4381_s28 + $0x10] sm:$0xff] %v2914_v45   ;;  %2960 = vst [vmem:[%s4381_s28 + $0x30] sm:$0xff] %v2934_v11   ;;  %v3201_v63 = vadd.f32 %v3200_v40, %v3199_v7  ;;  %v3225_v60 = vadd.f32 %v3224_v1, %v3223_v41  ;;  %v2202_v10 = vadd.f32 %v4375_v62, %v2179_v56  ;;  %3417 = vmatprep.subr.mxu1 (%p1945_p8), %v3817_v20 }
 0x637   : > { %v2210_v17 = vadd.f32 %v4375_v62, %v2187_v57  ;;  %3418 = vmatpush3.msra.mxu1 (%p1945_p8), %v2483_v51 }
 0x638   : > { %v2180_v14 = vmul.f32 %v3201_v63, %v4369_v4  ;;  %v2188_v16 = vmul.f32 %v3225_v60, %v2171_v61  ;;  %3419 = vmatprep.subr.mxu1 (%p1945_p8), %v3817_v20 }
 0x639   :  { %3420 = vmatpush3.msra.mxu1 (%p1945_p8), %v2482_v9 }
 0x63a   : > { %v2203_v25 = vadd.f32 %v4375_v62, %v2180_v14  ;;  %v2211_v26 = vadd.f32 %v4375_v62, %v2188_v16  ;;  %1947 = sbr.rel (!%p1945_p8) target bundleno = 1335 (0x537), region = 136  ;;  %3421 = vmatprep.subr.mxu1 (%p1945_p8), %v3817_v20 }
 0x63b   :  { %3422 = vmatpush3.msra.mxu1 (%p1945_p8), %v2481_v53 }
 0x63c   : > { %v2919_v28 = vpack.c.bf16 %v2203_v25, %v2202_v10  ;;  %v2939_v29 = vpack.c.bf16 %v2211_v26, %v2210_v17  ;;  %3423 = vmatprep.subr.mxu1 (%p1945_p8), %v3817_v20 }
 0x63d   :  { %3424 = vmatpush3.msra.mxu1 (%p1945_p8), %v2480_v18 }
 0x63e   : > { %2957 = vst [vmem:[%s4381_s28 + $0x18] sm:$0xff] %v2919_v28   ;;  %2961 = vst [vmem:[%s4381_s28 + $0x38] sm:$0xff] %v2939_v29   ;;  %3425 = vmatprep.subr.mxu1 (%p1945_p8), %v3817_v20 }
 0x63f   :  { %3426 = vmatpush3.msra.mxu1 %v2479_v37 }
 0x640   :  { %3427 = vmatprep.subr.mxu1 %v3817_v20 }
 0x641   :  { %3428 = vmatpush3.msra.mxu1 %v2478_v21 }
 0x642   :  { %3429 = vmatprep.subr.mxu1 %v3817_v20 }
 0x643   :  { %3430 = vmatpush3.msra.mxu1 %v2477_v22 }
 0x644   :  { %3431 = vmatprep.subr.mxu1 %v3817_v20 }
 0x645   :  { %v3656_v12 = vld [vmem:[#allocation2 + $0x78] sm:$0xff]   ;;  %v3658_v38 = vld [vmem:[#allocation2 + $0x70] sm:$0xff]   ;;  %v3660_v62 = vld [vmem:[#allocation2 + $0x68] sm:$0xff]   ;;  %3432 = vmatpush3.msra.mxu1 %v2476_v5 }
 0x646   :  { %v3657_v4 = vld [vmem:[#allocation2 + $0x38] sm:$0xff]   ;;  %3226 = vmatprep.subr.bf16.mxu0 %v3656_v12  ;;  %v3659_v30 = vld [vmem:[#allocation2 + $0x30] sm:$0xff]   ;;  %v3661_v31 = vld [vmem:[#allocation2 + $0x28] sm:$0xff]   ;;  %3433 = vmatprep.subr.mxu1 %v3817_v20 }
 0x647   :  { %3227 = vmatpush3.bf16.msra.mxu0 %v3657_v4  ;;  %v3662_v13 = vld [vmem:[#allocation2 + $0x60] sm:$0xff]   ;;  %v3664_v15 = vld [vmem:[#allocation2 + $0x58] sm:$0xff]   ;;  %v3666_v24 = vld [vmem:[#allocation2 + $0x50] sm:$0xff]   ;;  %3434 = vmatpush3.msra.mxu1 %v2475_v27 }
 0x648   :  { %3228 = vmatprep.subr.bf16.mxu0 %v3658_v38  ;;  %v3663_v42 = vld [vmem:[#allocation2 + $0x20] sm:$0xff]   ;;  %v3665_v23 = vld [vmem:[#allocation2 + $0x18] sm:$0xff]   ;;  %v3667_v58 = vld [vmem:[#allocation2 + $0x10] sm:$0xff]   ;;  %3435 = vmatprep.subr.mxu1 %v3817_v20 }
 0x649   :  { %v3668_v48 = vld [vmem:[#allocation2 + $0x48] sm:$0xff]   ;;  %v3670_v6 = vld [vmem:[#allocation2 + $0x40] sm:$0xff]   ;;  %3436 = vmatpush3.msra.mxu1 %v2474_v36 }
 0x64a   :  { %v3669_v50 = vld [vmem:[#allocation2 + $0x8] sm:$0xff]   ;;  %v3671_v52 = vld [vmem:[#allocation2] sm:$0xff]   ;;  %3437 = vmatprep.subr.mxu1 %v3817_v20 }
 0x64b   :  { %3229 = vmatpush3.bf16.msra.mxu0 %v3659_v30  ;;  %3438 = vmatpush3.msra.mxu1 %v2473_v34 }
 0x64c   :  { %3230 = vmatprep.subr.bf16.mxu0 %v3660_v62  ;;  %3439 = vmatprep.subr.mxu1 %v3817_v20 }
 0x64d   :  { %3440 = vmatpush3.msra.mxu1 %v2472_v35 }
 0x64f   :  { %3231 = vmatpush3.bf16.msra.mxu0 %v3661_v31 }
 0x650   :  { %3232 = vmatprep.subr.bf16.mxu0 %v3662_v13 }
 0x653   :  { %3233 = vmatpush3.bf16.msra.mxu0 %v3663_v42 }
 0x654   :  { %3234 = vmatprep.subr.bf16.mxu0 %v3664_v15 }
 0x657   :  { %3235 = vmatpush3.bf16.msra.mxu0 %v3665_v23 }
 0x658   :  { %3236 = vmatprep.subr.bf16.mxu0 %v3666_v24 }
 0x65b   :  { %3237 = vmatpush3.bf16.msra.mxu0 %v3667_v58 }
 0x65c   :  { %3238 = vmatprep.subr.bf16.mxu0 %v3668_v48 }
 0x65f   :  { %3239 = vmatpush3.bf16.msra.mxu0 %v3669_v50 }
 0x660   :  { %3240 = vmatprep.subr.bf16.mxu0 %v3670_v6 }
 0x663   :  { %3241 = vmatpush3.bf16.msra.mxu0 %v3671_v52 }
 0x666   :  { %2465 = vmatmul.mubr.bf16.vlgmr.msra.gmra.mxu0 %v2751_v19 }
 0x726   :  { %v3242_v43 = vpop.f32.mrf.mxu0 }
 0x728   :  { %v3243_v46 = vpop.f32.mrf.mxu0 }
 0x729   :  { %v3244_v8 = vadd.f32 %v3243_v46, %v3242_v43 }
 0x72a   :  { %v3245_v47 = vpop.f32.mrf.mxu0 }
 0x72b   :  { %3442 = vmatmul.mubr.f32.vlgmr.msra.gmra.mxu1 %v3244_v8 }
 0x72c   :  { %v3246_v0 = vpop.f32.mrf.mxu0 }
 0x7eb   :  { %v2561_v2 = vpop.f32.mrf.mxu1 }
 0x7ec   :  { %v2562_v3 = vadd.f32 %v2769_v55, %v2561_v2 }
 0x7ed   :  { %v3443_v7 = vpop.f32.mrf.mxu1 }
 0x7ee   :  { %2565 = vst [vmem:[#allocation12] sm:$0xff] %v2562_v3 }
 0x7ef   :  { %3765 = shalt.err (!%p3762_p13)
}
 0x7f0   :  { %2575 = dma.vmem_to_hbm [thread:$0]  %s2573_s30, 128, %s4448_s12, [#allocation6]  }
 0x7f1   :  { %3792 = dma.done.wait [#allocation6], 128  }
 0x7f2   :  { %3793 = vsyncadd [#allocation6], 4294967168 }
 0x7f3   :  { %2579 = vsyncpa [#allocation5], 1 }
 0x7f4   :  { %2580 = vsyncpa [#allocation8], 1 }
 0x7f5   :  { %2581 = vsyncpa [#allocation11], 1 }
 0x7f6   :  { %2582 = vsyncpa [#allocation6], 1 }

</bundles_post_ra>
